<compile_context>
chip_gen: v7x
topology: tpu7x:2x2x1
jax: 0.10.0
libtpu: 0.0.40
codegen_flags: <defaults>
</compile_context>

<pallas_src>
import functools

import jax
import jax.numpy as jnp
from jax.experimental import pallas as pl
from jax.experimental.pallas import tpu as pltpu

# ----------------------- small synthetic config -----------------------------
VOCAB = 128
HIDDEN = 64
N_HEADS = 4
HEAD_DIM = HIDDEN // N_HEADS          # 16
N_KV_HEADS = 2
MOE_INTER = 64
SHARED_INTER = 64
N_EXPERTS = 4
TOP_K = 2
M_STATE = 16                          # mamba_d_state
M_CONV = 4                            # mamba_d_conv
M_EXPAND = 2
M_INTER = M_EXPAND * HIDDEN           # 128
M_NGROUPS = 1
M_HEADS = 4
M_HEAD_DIM = M_INTER // M_HEADS       # 32
CONV_DIM = M_INTER + 2 * M_NGROUPS * M_STATE   # 160
LAYER_TYPES = ("mamba", "attention")
RMS_EPS = 1e-6
EMB_MULT = 12.0
RES_MULT = 0.22
ATTN_MULT = 1.0 / (HEAD_DIM ** 0.5)   # config.attention_multiplier
ROPE_THETA = 10000.0
SEQ = 8
DTYPE = jnp.float32
NEG = -1e30


# ------------------------------ in-kernel helpers ----------------------------
def _mxu_dot(a, b):
    """Weight matmul: bf16 MXU operands, f32 accumulation."""
    return jax.lax.dot_general(
        a.astype(jnp.bfloat16), b.astype(jnp.bfloat16),
        dimension_numbers=(((1,), (0,)), ((), ())),
        preferred_element_type=jnp.float32)


def _rms(x, w, eps):
    var = jnp.mean(x * x, axis=-1, keepdims=True)
    return x * jax.lax.rsqrt(var + eps) * w


def _silu(x):
    return x * jax.nn.sigmoid(x)


def _softplus(x):
    # stable softplus with only exp/log (no log1p dependence)
    return jnp.maximum(x, 0.0) + jnp.log(1.0 + jnp.exp(-jnp.abs(x)))


# ----------------------------- Pallas kernels -------------------------------
def _rmsnorm_kernel(eps, x_ref, w_ref, o_ref):
    x = x_ref[...].astype(jnp.float32)
    o_ref[...] = _rms(x, w_ref[...].astype(jnp.float32), eps).astype(o_ref.dtype)


def rmsnorm(x, w, eps=RMS_EPS):
    return pl.pallas_call(
        functools.partial(_rmsnorm_kernel, eps),
        out_shape=jax.ShapeDtypeStruct(x.shape, x.dtype),
    )(x, w)


def _attn_block_kernel(eps, res_mult, scale, n_heads, n_kv, head_dim,
                       x_ref, ln_ref, qkv_w_ref, o_w_ref, cos_ref, sin_ref,
                       o_ref):
    x = x_ref[...].astype(jnp.float32)                 # [T, H]  (residual)
    t = x.shape[0]
    h = _rms(x, ln_ref[...].astype(jnp.float32), eps)  # input layernorm

    qkv = _mxu_dot(h, qkv_w_ref[...])                  # [T, (H+2KV)*D] = [T,128]
    qd = n_heads * head_dim
    kvd = n_kv * head_dim
    group = n_heads // n_kv
    half = head_dim // 2

    cos = cos_ref[...].astype(jnp.float32)             # [T, half]
    sin = sin_ref[...].astype(jnp.float32)

    def rope(u):                                       # neox-style rotary
        u1 = u[:, :half]
        u2 = u[:, half:]
        return jnp.concatenate([u1 * cos - u2 * sin, u2 * cos + u1 * sin],
                               axis=-1)

    # rotate each kv head once (shared across its query-head group)
    k_rot, v_list = [], []
    for g in range(n_kv):
        k_h = qkv[:, qd + g * head_dim:qd + (g + 1) * head_dim]
        v_h = qkv[:, qd + kvd + g * head_dim:qd + kvd + (g + 1) * head_dim]
        k_rot.append(rope(k_h))
        v_list.append(v_h)

    ri = jax.lax.broadcasted_iota(jnp.int32, (t, t), 0)
    ci = jax.lax.broadcasted_iota(jnp.int32, (t, t), 1)
    causal = ci <= ri

    outs = []
    for head in range(n_heads):                        # all heads, one launch
        q_h = rope(qkv[:, head * head_dim:(head + 1) * head_dim])
        g = head // group
        # contraction on the last axis of both (no materialized k.T)
        s = jax.lax.dot_general(
            q_h.astype(jnp.bfloat16), k_rot[g].astype(jnp.bfloat16),
            dimension_numbers=(((1,), (1,)), ((), ())),
            preferred_element_type=jnp.float32) * scale
        s = jnp.where(causal, s, NEG)
        s = s - jnp.max(s, axis=-1, keepdims=True)
        p = jnp.exp(s)
        p = p * pl.reciprocal(jnp.sum(p, axis=-1, keepdims=True), approx=True)
        outs.append(_mxu_dot(p, v_list[g]))            # [T, D]

    attn = jnp.concatenate(outs, axis=-1)              # lane-dense [T, H*D]
    out = _mxu_dot(attn, o_w_ref[...])                 # o_proj
    o_ref[...] = (x + res_mult * out).astype(o_ref.dtype)


def attention_block(x, cos, sin, p):
    return pl.pallas_call(
        functools.partial(_attn_block_kernel, RMS_EPS, RES_MULT, ATTN_MULT,
                          N_HEADS, N_KV_HEADS, HEAD_DIM),
        out_shape=jax.ShapeDtypeStruct(x.shape, x.dtype),
    )(x, p["in_ln"], p["qkv_w"], p["o_w"], cos, sin)


def _mamba_block_kernel(eps, res_mult, d_conv, d_state, d_inner, conv_dim,
                        x_ref, ln_ref, in_w_ref, conv_w_ref, conv_b_ref,
                        a_ref, dtb_ref, d_skip_ref, gnorm_ref, out_w_ref,
                        o_ref, y_scr):
    x = x_ref[...].astype(jnp.float32)                 # [T, H]  (residual)
    t = x.shape[0]
    h = _rms(x, ln_ref[...].astype(jnp.float32), eps)  # input layernorm

    proj = _mxu_dot(h, in_w_ref[...])                  # [T, d_inner+conv+d_inner]
    gate = proj[:, :d_inner]                           # [T, P]
    xbc = proj[:, d_inner:d_inner + conv_dim]          # [T, conv_dim]
    dt_raw = proj[:, d_inner + conv_dim:]              # [T, P] (pre-expanded)

    # depthwise causal conv as per-tap shift-matrix matmuls (no pad / roll)
    ri = jax.lax.broadcasted_iota(jnp.int32, (t, t), 0)
    ci = jax.lax.broadcasted_iota(jnp.int32, (t, t), 1)
    acc = jnp.zeros((t, conv_dim), jnp.float32)
    for s in range(d_conv):
        shift_m = (ri - ci == s).astype(jnp.float32)   # shifted[t] = xbc[t-s]
        shifted = jnp.dot(shift_m, xbc, preferred_element_type=jnp.float32)
        acc = acc + shifted * conv_w_ref[d_conv - 1 - s:d_conv - s, :]
    acc = acc + conv_b_ref[...]
    xbc = _silu(acc)

    xs = xbc[:, :d_inner]                              # [T, P]
    b = xbc[:, d_inner:d_inner + d_state]              # [T, N]
    c = xbc[:, d_inner + d_state:]                     # [T, N]

    dt = _softplus(dt_raw + dtb_ref[...])              # [T, P]
    d_a = jnp.exp(dt * a_ref[...])                     # [T, P]
    dtx = dt * xs

    # sequential Mamba2 SSD recurrence, zero initial state (prefill)
    state = jnp.zeros((d_state, d_inner), jnp.float32)
    for tt in range(t):                                # static, SEQ is small
        outer = jax.lax.dot_general(                   # B_t^T dtx_t  -> [N, P]
            b[tt:tt + 1, :], dtx[tt:tt + 1, :],
            dimension_numbers=(((0,), (0,)), ((), ())),
            preferred_element_type=jnp.float32)
        state = state * d_a[tt:tt + 1, :] + outer
        y_t = jax.lax.dot_general(                     # C_t state  -> [1, P]
            c[tt:tt + 1, :], state,
            dimension_numbers=(((1,), (0,)), ((), ())),
            preferred_element_type=jnp.float32)
        y_scr[tt:tt + 1, :] = y_t
    y = y_scr[...] + d_skip_ref[...] * xs              # D skip connection

    # gated RMSNorm: rmsnorm(y * silu(gate)) * w
    y = y * _silu(gate)
    y = _rms(y, gnorm_ref[...].astype(jnp.float32), eps)

    out = _mxu_dot(y, out_w_ref[...])                  # out_proj
    o_ref[...] = (x + res_mult * out).astype(o_ref.dtype)


def mamba_block(x, p):
    return pl.pallas_call(
        functools.partial(_mamba_block_kernel, RMS_EPS, RES_MULT, M_CONV,
                          M_STATE, M_INTER, CONV_DIM),
        out_shape=jax.ShapeDtypeStruct(x.shape, x.dtype),
        scratch_shapes=[pltpu.VMEM((x.shape[0], M_INTER), jnp.float32)],
    )(x, p["in_ln"], p["in_proj"], p["conv_w"], p["conv_b"],
      p["A_full"], p["dt_bias_full"], p["D_full"], p["norm_w"], p["out_proj"])


def _ffn_block_kernel(eps, res_mult, n_experts, top_k, inter, sh_inter,
                      x_ref, ln_ref, router_w_ref, w13_ref, w2_ref,
                      sh_w13_ref, sh_down_ref, o_ref):
    x = x_ref[...].astype(jnp.float32)                 # [T, H]  (residual)
    h = _rms(x, ln_ref[...].astype(jnp.float32), eps)  # post-attn layernorm

    # router: softmax -> dense top-k gates (renormalized), all in-kernel
    logits = jnp.dot(h, router_w_ref[...], preferred_element_type=jnp.float32)
    logits = logits - jnp.max(logits, axis=-1, keepdims=True)
    probs = jnp.exp(logits)
    probs = probs / jnp.sum(probs, axis=-1, keepdims=True)
    work = probs
    thresh = probs
    for _ in range(top_k):                             # thresh := k-th largest
        thresh = jnp.max(work, axis=-1, keepdims=True)
        work = jnp.where(work >= thresh, NEG, work)
    gates = jnp.where(probs >= thresh, probs, 0.0)
    gates = gates / jnp.sum(gates, axis=-1, keepdims=True)   # [T, E]

    # experts: fused gate|up weights (lane-dense 2*inter), dense over experts
    hb = h.astype(jnp.bfloat16)
    acc = jnp.zeros(o_ref.shape, jnp.float32)
    for e in range(n_experts):                         # static expert loop
        gu = jax.lax.dot_general(
            hb, w13_ref[e].astype(jnp.bfloat16),
            dimension_numbers=(((1,), (0,)), ((), ())),
            preferred_element_type=jnp.float32)        # [T, 2*inter]
        act = _silu(gu[:, :inter]) * gu[:, inter:]
        y_e = _mxu_dot(act, w2_ref[e])
        acc = acc + y_e * gates[:, e:e + 1]

    # shared SiLU-gated MLP (fused gate|up weight)
    gu = _mxu_dot(h, sh_w13_ref[...])                  # [T, 2*sh_inter]
    act = _silu(gu[:, :sh_inter]) * gu[:, sh_inter:]
    shared = _mxu_dot(act, sh_down_ref[...])

    o_ref[...] = (x + res_mult * (acc + shared)).astype(o_ref.dtype)


def ffn_block(x, p):
    return pl.pallas_call(
        functools.partial(_ffn_block_kernel, RMS_EPS, RES_MULT, N_EXPERTS,
                          TOP_K, MOE_INTER, SHARED_INTER),
        out_shape=jax.ShapeDtypeStruct(x.shape, x.dtype),
    )(x, p["post_ln"], p["gate_w"], p["moe_w13"], p["moe_w2"],
      p["sh_w13"], p["sh_down"])


# ------------------------- model glue (plain JAX) ---------------------------
def granite_moe_hybrid_forward(input_ids, positions, params):
    # TODO(synk): embedding gather left to XLA (no efficient Pallas gather at
    #             this size); everything downstream runs in fused kernels.
    h = jnp.take(params["embed"], input_ids, axis=0) * EMB_MULT

    inv_freq = 1.0 / (ROPE_THETA ** (
        jnp.arange(0, HEAD_DIM, 2, dtype=jnp.float32) / HEAD_DIM))
    freqs = positions.astype(jnp.float32)[:, None] * inv_freq[None, :]
    cos = jnp.cos(freqs).astype(DTYPE)
    sin = jnp.sin(freqs).astype(DTYPE)

    for i, lt in enumerate(LAYER_TYPES):
        p = params["layers"][i]
        if lt == "mamba":
            h = mamba_block(h, p)          # mixer + first residual
        else:
            h = attention_block(h, cos, sin, p)
        h = ffn_block(h, p)                # MoE + shared MLP + second residual
    return rmsnorm(h, params["final_norm"])


# --------------------------- deterministic init ------------------------------
def init_params(key):
    kit = iter(jax.random.split(key, 64))

    def nrm(shape, scale=0.05):
        return (scale * jax.random.normal(next(kit), shape)).astype(DTYPE)

    def ffn_params():
        w1 = nrm((N_EXPERTS, HIDDEN, MOE_INTER))
        w3 = nrm((N_EXPERTS, HIDDEN, MOE_INTER))
        return dict(
            gate_w=nrm((HIDDEN, N_EXPERTS)),
            moe_w13=jnp.concatenate([w1, w3], axis=-1),       # lane-dense 128
            moe_w2=nrm((N_EXPERTS, MOE_INTER, HIDDEN)),
            sh_w13=jnp.concatenate([nrm((HIDDEN, SHARED_INTER)),
                                    nrm((HIDDEN, SHARED_INTER))], axis=-1),
            sh_down=nrm((SHARED_INTER, HIDDEN)),
        )

    layers = []
    for lt in LAYER_TYPES:
        p = dict(in_ln=1.0 + nrm((1, HIDDEN)), post_ln=1.0 + nrm((1, HIDDEN)))
        p.update(ffn_params())
        if lt == "mamba":
            in_core = nrm((HIDDEN, M_INTER + CONV_DIM))
            in_dt = nrm((HIDDEN, M_HEADS))
            a_heads = (-jnp.exp(nrm((M_HEADS,), 0.5))).astype(DTYPE)
            d_heads = (1.0 + nrm((M_HEADS,))).astype(DTYPE)
            dtb = nrm((M_HEADS,), 0.1)
            p.update(dict(
                # dt columns pre-expanded head->channel so in_proj directly
                # emits a lane-dense [T, M_INTER] dt block.
                in_proj=jnp.concatenate(
                    [in_core, jnp.repeat(in_dt, M_HEAD_DIM, axis=1)], axis=1),
                conv_w=nrm((M_CONV, CONV_DIM), 0.2),
                conv_b=nrm((1, CONV_DIM), 0.05),
                A_full=jnp.repeat(a_heads, M_HEAD_DIM)[None, :],
                dt_bias_full=jnp.repeat(dtb, M_HEAD_DIM)[None, :],
                D_full=jnp.repeat(d_heads, M_HEAD_DIM)[None, :],
                norm_w=1.0 + nrm((1, M_INTER)),
                out_proj=nrm((M_INTER, HIDDEN)),
            ))
        else:
            p.update(dict(
                qkv_w=nrm((HIDDEN, (N_HEADS + 2 * N_KV_HEADS) * HEAD_DIM)),
                o_w=nrm((N_HEADS * HEAD_DIM, HIDDEN)),
            ))
        layers.append(p)

    return dict(embed=nrm((VOCAB, HIDDEN)),
                layers=layers,
                final_norm=1.0 + nrm((1, HIDDEN)))


if __name__ == "__main__":
    key = jax.random.PRNGKey(0)
    kp, ki = jax.random.split(key)
    params = init_params(kp)
    input_ids = jax.random.randint(ki, (SEQ,), 0, VOCAB, dtype=jnp.int32)
    positions = jnp.arange(SEQ, dtype=jnp.int32)
    out = granite_moe_hybrid_forward(input_ids, positions, params)
    jax.block_until_ready(out)
    assert out.shape == (SEQ, HIDDEN)
    assert bool(jnp.all(jnp.isfinite(out)))
    print("KERNEL_OK")
</pallas_src>

<mosaic_0001>
module attributes {stable_mosaic.version = 11 : i64} {
  func.func @_mamba_block_kernel(%arg0: memref<8x64xf32, #tpu.memory_space<vmem>>, %arg1: memref<1x64xf32, #tpu.memory_space<vmem>>, %arg2: memref<64x416xf32, #tpu.memory_space<vmem>>, %arg3: memref<4x160xf32, #tpu.memory_space<vmem>>, %arg4: memref<1x160xf32, #tpu.memory_space<vmem>>, %arg5: memref<1x128xf32, #tpu.memory_space<vmem>>, %arg6: memref<1x128xf32, #tpu.memory_space<vmem>>, %arg7: memref<1x128xf32, #tpu.memory_space<vmem>>, %arg8: memref<1x128xf32, #tpu.memory_space<vmem>>, %arg9: memref<128x64xf32, #tpu.memory_space<vmem>>, %arg10: memref<8x64xf32, #tpu.memory_space<vmem>>, %arg11: memref<8x128xf32, #tpu.memory_space<vmem>>) attributes {dimension_semantics = [], scalar_prefetch = 0 : i64, scratch_operands = 1 : i64, tpu.core_type = #tpu.core_type<tc>} {
    %c0 = arith.constant 0 : index
    %c0_0 = arith.constant 0 : index
    %0 = vector.load %arg0[%c0, %c0_0] : memref<8x64xf32, #tpu.memory_space<vmem>>, vector<8x64xf32>
    %c0_1 = arith.constant 0 : index
    %c0_2 = arith.constant 0 : index
    %1 = vector.load %arg1[%c0_1, %c0_2] : memref<1x64xf32, #tpu.memory_space<vmem>>, vector<1x64xf32>
    %2 = arith.mulf %0, %0 : vector<8x64xf32>
    %cst = arith.constant dense<0.000000e+00> : vector<8xf32>
    %3 = vector.multi_reduction <add>, %2, %cst [1] : vector<8x64xf32> to vector<8xf32>
    %4 = vector.shape_cast %3 : vector<8xf32> to vector<8x1xf32>
    %cst_3 = arith.constant 6.400000e+01 : f32
    %5 = vector.broadcast %cst_3 : f32 to vector<8x1xf32>
    %6 = arith.divf %4, %5 : vector<8x1xf32>
    %cst_4 = arith.constant 9.99999997E-7 : f32
    %7 = vector.broadcast %cst_4 : f32 to vector<8x1xf32>
    %8 = arith.addf %6, %7 : vector<8x1xf32>
    %9 = math.rsqrt %8 : vector<8x1xf32>
    %10 = vector.broadcast %9 : vector<8x1xf32> to vector<8x64xf32>
    %11 = arith.mulf %0, %10 : vector<8x64xf32>
    %12 = vector.broadcast %1 : vector<1x64xf32> to vector<8x64xf32>
    %13 = arith.mulf %11, %12 : vector<8x64xf32>
    %c0_5 = arith.constant 0 : index
    %c0_6 = arith.constant 0 : index
    %14 = vector.load %arg2[%c0_5, %c0_6] : memref<64x416xf32, #tpu.memory_space<vmem>>, vector<64x416xf32>
    %15 = arith.truncf %13 : vector<8x64xf32> to vector<8x64xbf16>
    %16 = arith.truncf %14 : vector<64x416xf32> to vector<64x416xbf16>
    %cst_7 = arith.constant dense<0.000000e+00> : vector<8x416xf32>
    %17 = tpu.matmul %15, %16, %cst_7 {dimension_numbers = #tpu.dot_dimension_numbers<[1], [0], [0], [1], [0, 0, 1, 1], [], []>} : vector<8x64xbf16>, vector<64x416xbf16>, vector<8x416xf32> -> vector<8x416xf32>
    %18 = vector.extract_strided_slice %17 {offsets = [0, 0], sizes = [8, 128], strides = [1, 1]} : vector<8x416xf32> to vector<8x128xf32>
    %19 = vector.extract_strided_slice %17 {offsets = [0, 128], sizes = [8, 160], strides = [1, 1]} : vector<8x416xf32> to vector<8x160xf32>
    %20 = vector.extract_strided_slice %17 {offsets = [0, 288], sizes = [8, 128], strides = [1, 1]} : vector<8x416xf32> to vector<8x128xf32>
    %21 = tpu.iota {dimensions = array<i32: 0>} : vector<8x8xi32>
    %22 = tpu.iota {dimensions = array<i32: 1>} : vector<8x8xi32>
    %cst_8 = arith.constant 0.000000e+00 : f32
    %23 = vector.broadcast %cst_8 : f32 to vector<8x160xf32>
    %24 = arith.subi %21, %22 : vector<8x8xi32>
    %c0_i32 = arith.constant 0 : i32
    %25 = vector.broadcast %c0_i32 : i32 to vector<8x8xi32>
    %26 = arith.cmpi eq, %24, %25 : vector<8x8xi32>
    %27 = arith.extui %26 : vector<8x8xi1> to vector<8x8xi32>
    %28 = arith.sitofp %27 : vector<8x8xi32> to vector<8x8xf32>
    %cst_9 = arith.constant dense<0.000000e+00> : vector<8x160xf32>
    %29 = tpu.matmul %28, %19, %cst_9 {dimension_numbers = #tpu.dot_dimension_numbers<[1], [0], [0], [1], [0, 0, 1, 1], [], []>} : vector<8x8xf32>, vector<8x160xf32>, vector<8x160xf32> -> vector<8x160xf32>
    %c3 = arith.constant 3 : index
    %c0_10 = arith.constant 0 : index
    %30 = vector.load %arg3[%c3, %c0_10] : memref<4x160xf32, #tpu.memory_space<vmem>>, vector<1x160xf32>
    %31 = vector.broadcast %30 : vector<1x160xf32> to vector<8x160xf32>
    %32 = arith.mulf %29, %31 : vector<8x160xf32>
    %33 = arith.addf %23, %32 : vector<8x160xf32>
    %34 = arith.subi %21, %22 : vector<8x8xi32>
    %c1_i32 = arith.constant 1 : i32
    %35 = vector.broadcast %c1_i32 : i32 to vector<8x8xi32>
    %36 = arith.cmpi eq, %34, %35 : vector<8x8xi32>
    %37 = arith.extui %36 : vector<8x8xi1> to vector<8x8xi32>
    %38 = arith.sitofp %37 : vector<8x8xi32> to vector<8x8xf32>
    %cst_11 = arith.constant dense<0.000000e+00> : vector<8x160xf32>
    %39 = tpu.matmul %38, %19, %cst_11 {dimension_numbers = #tpu.dot_dimension_numbers<[1], [0], [0], [1], [0, 0, 1, 1], [], []>} : vector<8x8xf32>, vector<8x160xf32>, vector<8x160xf32> -> vector<8x160xf32>
    %c2 = arith.constant 2 : index
    %c0_12 = arith.constant 0 : index
    %40 = vector.load %arg3[%c2, %c0_12] : memref<4x160xf32, #tpu.memory_space<vmem>>, vector<1x160xf32>
    %41 = vector.broadcast %40 : vector<1x160xf32> to vector<8x160xf32>
    %42 = arith.mulf %39, %41 : vector<8x160xf32>
    %43 = arith.addf %33, %42 : vector<8x160xf32>
    %44 = arith.subi %21, %22 : vector<8x8xi32>
    %c2_i32 = arith.constant 2 : i32
    %45 = vector.broadcast %c2_i32 : i32 to vector<8x8xi32>
    %46 = arith.cmpi eq, %44, %45 : vector<8x8xi32>
    %47 = arith.extui %46 : vector<8x8xi1> to vector<8x8xi32>
    %48 = arith.sitofp %47 : vector<8x8xi32> to vector<8x8xf32>
    %cst_13 = arith.constant dense<0.000000e+00> : vector<8x160xf32>
    %49 = tpu.matmul %48, %19, %cst_13 {dimension_numbers = #tpu.dot_dimension_numbers<[1], [0], [0], [1], [0, 0, 1, 1], [], []>} : vector<8x8xf32>, vector<8x160xf32>, vector<8x160xf32> -> vector<8x160xf32>
    %c1 = arith.constant 1 : index
    %c0_14 = arith.constant 0 : index
    %50 = vector.load %arg3[%c1, %c0_14] : memref<4x160xf32, #tpu.memory_space<vmem>>, vector<1x160xf32>
    %51 = vector.broadcast %50 : vector<1x160xf32> to vector<8x160xf32>
    %52 = arith.mulf %49, %51 : vector<8x160xf32>
    %53 = arith.addf %43, %52 : vector<8x160xf32>
    %54 = arith.subi %21, %22 : vector<8x8xi32>
    %c3_i32 = arith.constant 3 : i32
    %55 = vector.broadcast %c3_i32 : i32 to vector<8x8xi32>
    %56 = arith.cmpi eq, %54, %55 : vector<8x8xi32>
    %57 = arith.extui %56 : vector<8x8xi1> to vector<8x8xi32>
    %58 = arith.sitofp %57 : vector<8x8xi32> to vector<8x8xf32>
    %cst_15 = arith.constant dense<0.000000e+00> : vector<8x160xf32>
    %59 = tpu.matmul %58, %19, %cst_15 {dimension_numbers = #tpu.dot_dimension_numbers<[1], [0], [0], [1], [0, 0, 1, 1], [], []>} : vector<8x8xf32>, vector<8x160xf32>, vector<8x160xf32> -> vector<8x160xf32>
    %c0_16 = arith.constant 0 : index
    %c0_17 = arith.constant 0 : index
    %60 = vector.load %arg3[%c0_16, %c0_17] : memref<4x160xf32, #tpu.memory_space<vmem>>, vector<1x160xf32>
    %61 = vector.broadcast %60 : vector<1x160xf32> to vector<8x160xf32>
    %62 = arith.mulf %59, %61 : vector<8x160xf32>
    %63 = arith.addf %53, %62 : vector<8x160xf32>
    %c0_18 = arith.constant 0 : index
    %c0_19 = arith.constant 0 : index
    %64 = vector.load %arg4[%c0_18, %c0_19] : memref<1x160xf32, #tpu.memory_space<vmem>>, vector<1x160xf32>
    %65 = vector.broadcast %64 : vector<1x160xf32> to vector<8x160xf32>
    %66 = arith.addf %63, %65 : vector<8x160xf32>
    %67 = arith.negf %66 : vector<8x160xf32>
    %68 = math.exp %67 : vector<8x160xf32>
    %cst_20 = arith.constant 1.000000e+00 : f32
    %69 = vector.broadcast %cst_20 : f32 to vector<8x160xf32>
    %70 = arith.addf %69, %68 : vector<8x160xf32>
    %71 = arith.divf %69, %70 : vector<8x160xf32>
    %72 = arith.mulf %66, %71 : vector<8x160xf32>
    %73 = vector.extract_strided_slice %72 {offsets = [0, 0], sizes = [8, 128], strides = [1, 1]} : vector<8x160xf32> to vector<8x128xf32>
    %74 = vector.extract_strided_slice %72 {offsets = [0, 128], sizes = [8, 16], strides = [1, 1]} : vector<8x160xf32> to vector<8x16xf32>
    %75 = vector.extract_strided_slice %72 {offsets = [0, 144], sizes = [8, 16], strides = [1, 1]} : vector<8x160xf32> to vector<8x16xf32>
    %c0_21 = arith.constant 0 : index
    %c0_22 = arith.constant 0 : index
    %76 = vector.load %arg6[%c0_21, %c0_22] : memref<1x128xf32, #tpu.memory_space<vmem>>, vector<1x128xf32>
    %77 = vector.broadcast %76 : vector<1x128xf32> to vector<8x128xf32>
    %78 = arith.addf %20, %77 : vector<8x128xf32>
    %cst_23 = arith.constant 0.000000e+00 : f32
    %79 = vector.broadcast %cst_23 : f32 to vector<8x128xf32>
    %80 = arith.maximumf %78, %79 : vector<8x128xf32>
    %81 = math.absf %78 : vector<8x128xf32>
    %cst_24 = arith.constant 0.000000e+00 : f32
    %82 = vector.broadcast %cst_24 : f32 to vector<8x128xf32>
    %83 = arith.subf %82, %81 : vector<8x128xf32>
    %84 = math.exp %83 : vector<8x128xf32>
    %cst_25 = arith.constant 1.000000e+00 : f32
    %85 = vector.broadcast %cst_25 : f32 to vector<8x128xf32>
    %86 = arith.addf %85, %84 : vector<8x128xf32>
    %87 = math.log %86 : vector<8x128xf32>
    %88 = arith.addf %80, %87 : vector<8x128xf32>
    %c0_26 = arith.constant 0 : index
    %c0_27 = arith.constant 0 : index
    %89 = vector.load %arg5[%c0_26, %c0_27] : memref<1x128xf32, #tpu.memory_space<vmem>>, vector<1x128xf32>
    %90 = vector.broadcast %89 : vector<1x128xf32> to vector<8x128xf32>
    %91 = arith.mulf %88, %90 : vector<8x128xf32>
    %92 = math.exp %91 : vector<8x128xf32>
    %93 = arith.mulf %88, %73 : vector<8x128xf32>
    %cst_28 = arith.constant 0.000000e+00 : f32
    %94 = vector.broadcast %cst_28 : f32 to vector<16x128xf32>
    %95 = vector.extract_strided_slice %74 {offsets = [0, 0], sizes = [1, 16], strides = [1, 1]} : vector<8x16xf32> to vector<1x16xf32>
    %96 = vector.extract_strided_slice %93 {offsets = [0, 0], sizes = [1, 128], strides = [1, 1]} : vector<8x128xf32> to vector<1x128xf32>
    %cst_29 = arith.constant dense<0.000000e+00> : vector<16x128xf32>
    %97 = tpu.matmul %95, %96, %cst_29 {dimension_numbers = #tpu.dot_dimension_numbers<[0], [0], [1], [1], [0, 1, 1, 1], [], []>} : vector<1x16xf32>, vector<1x128xf32>, vector<16x128xf32> -> vector<16x128xf32>
    %98 = vector.extract_strided_slice %92 {offsets = [0, 0], sizes = [1, 128], strides = [1, 1]} : vector<8x128xf32> to vector<1x128xf32>
    %99 = vector.broadcast %98 : vector<1x128xf32> to vector<16x128xf32>
    %100 = arith.mulf %94, %99 : vector<16x128xf32>
    %101 = arith.addf %100, %97 : vector<16x128xf32>
    %102 = vector.extract_strided_slice %75 {offsets = [0, 0], sizes = [1, 16], strides = [1, 1]} : vector<8x16xf32> to vector<1x16xf32>
    %cst_30 = arith.constant dense<0.000000e+00> : vector<1x128xf32>
    %103 = tpu.matmul %102, %101, %cst_30 {dimension_numbers = #tpu.dot_dimension_numbers<[1], [0], [0], [1], [0, 0, 1, 1], [], []>} : vector<1x16xf32>, vector<16x128xf32>, vector<1x128xf32> -> vector<1x128xf32>
    %c0_31 = arith.constant 0 : index
    %c0_32 = arith.constant 0 : index
    %104 = vector.load %arg11[%c0_31, %c0_32] : memref<8x128xf32, #tpu.memory_space<vmem>>, vector<1x128xf32>
    tpu.vector_store %arg11[%c0_31, %c0_32], %103 {strides = array<i32>} : memref<8x128xf32, #tpu.memory_space<vmem>>, vector<1x128xf32>,
    %105 = vector.extract_strided_slice %74 {offsets = [1, 0], sizes = [1, 16], strides = [1, 1]} : vector<8x16xf32> to vector<1x16xf32>
    %106 = vector.extract_strided_slice %93 {offsets = [1, 0], sizes = [1, 128], strides = [1, 1]} : vector<8x128xf32> to vector<1x128xf32>
    %cst_33 = arith.constant dense<0.000000e+00> : vector<16x128xf32>
    %107 = tpu.matmul %105, %106, %cst_33 {dimension_numbers = #tpu.dot_dimension_numbers<[0], [0], [1], [1], [0, 1, 1, 1], [], []>} : vector<1x16xf32>, vector<1x128xf32>, vector<16x128xf32> -> vector<16x128xf32>
    %108 = vector.extract_strided_slice %92 {offsets = [1, 0], sizes = [1, 128], strides = [1, 1]} : vector<8x128xf32> to vector<1x128xf32>
    %109 = vector.broadcast %108 : vector<1x128xf32> to vector<16x128xf32>
    %110 = arith.mulf %101, %109 : vector<16x128xf32>
    %111 = arith.addf %110, %107 : vector<16x128xf32>
    %112 = vector.extract_strided_slice %75 {offsets = [1, 0], sizes = [1, 16], strides = [1, 1]} : vector<8x16xf32> to vector<1x16xf32>
    %cst_34 = arith.constant dense<0.000000e+00> : vector<1x128xf32>
    %113 = tpu.matmul %112, %111, %cst_34 {dimension_numbers = #tpu.dot_dimension_numbers<[1], [0], [0], [1], [0, 0, 1, 1], [], []>} : vector<1x16xf32>, vector<16x128xf32>, vector<1x128xf32> -> vector<1x128xf32>
    %c1_35 = arith.constant 1 : index
    %c0_36 = arith.constant 0 : index
    %114 = vector.load %arg11[%c1_35, %c0_36] : memref<8x128xf32, #tpu.memory_space<vmem>>, vector<1x128xf32>
    tpu.vector_store %arg11[%c1_35, %c0_36], %113 {strides = array<i32>} : memref<8x128xf32, #tpu.memory_space<vmem>>, vector<1x128xf32>,
    %115 = vector.extract_strided_slice %74 {offsets = [2, 0], sizes = [1, 16], strides = [1, 1]} : vector<8x16xf32> to vector<1x16xf32>
    %116 = vector.extract_strided_slice %93 {offsets = [2, 0], sizes = [1, 128], strides = [1, 1]} : vector<8x128xf32> to vector<1x128xf32>
    %cst_37 = arith.constant dense<0.000000e+00> : vector<16x128xf32>
    %117 = tpu.matmul %115, %116, %cst_37 {dimension_numbers = #tpu.dot_dimension_numbers<[0], [0], [1], [1], [0, 1, 1, 1], [], []>} : vector<1x16xf32>, vector<1x128xf32>, vector<16x128xf32> -> vector<16x128xf32>
    %118 = vector.extract_strided_slice %92 {offsets = [2, 0], sizes = [1, 128], strides = [1, 1]} : vector<8x128xf32> to vector<1x128xf32>
    %119 = vector.broadcast %118 : vector<1x128xf32> to vector<16x128xf32>
    %120 = arith.mulf %111, %119 : vector<16x128xf32>
    %121 = arith.addf %120, %117 : vector<16x128xf32>
    %122 = vector.extract_strided_slice %75 {offsets = [2, 0], sizes = [1, 16], strides = [1, 1]} : vector<8x16xf32> to vector<1x16xf32>
    %cst_38 = arith.constant dense<0.000000e+00> : vector<1x128xf32>
    %123 = tpu.matmul %122, %121, %cst_38 {dimension_numbers = #tpu.dot_dimension_numbers<[1], [0], [0], [1], [0, 0, 1, 1], [], []>} : vector<1x16xf32>, vector<16x128xf32>, vector<1x128xf32> -> vector<1x128xf32>
    %c2_39 = arith.constant 2 : index
    %c0_40 = arith.constant 0 : index
    %124 = vector.load %arg11[%c2_39, %c0_40] : memref<8x128xf32, #tpu.memory_space<vmem>>, vector<1x128xf32>
    tpu.vector_store %arg11[%c2_39, %c0_40], %123 {strides = array<i32>} : memref<8x128xf32, #tpu.memory_space<vmem>>, vector<1x128xf32>,
    %125 = vector.extract_strided_slice %74 {offsets = [3, 0], sizes = [1, 16], strides = [1, 1]} : vector<8x16xf32> to vector<1x16xf32>
    %126 = vector.extract_strided_slice %93 {offsets = [3, 0], sizes = [1, 128], strides = [1, 1]} : vector<8x128xf32> to vector<1x128xf32>
    %cst_41 = arith.constant dense<0.000000e+00> : vector<16x128xf32>
    %127 = tpu.matmul %125, %126, %cst_41 {dimension_numbers = #tpu.dot_dimension_numbers<[0], [0], [1], [1], [0, 1, 1, 1], [], []>} : vector<1x16xf32>, vector<1x128xf32>, vector<16x128xf32> -> vector<16x128xf32>
    %128 = vector.extract_strided_slice %92 {offsets = [3, 0], sizes = [1, 128], strides = [1, 1]} : vector<8x128xf32> to vector<1x128xf32>
    %129 = vector.broadcast %128 : vector<1x128xf32> to vector<16x128xf32>
    %130 = arith.mulf %121, %129 : vector<16x128xf32>
    %131 = arith.addf %130, %127 : vector<16x128xf32>
    %132 = vector.extract_strided_slice %75 {offsets = [3, 0], sizes = [1, 16], strides = [1, 1]} : vector<8x16xf32> to vector<1x16xf32>
    %cst_42 = arith.constant dense<0.000000e+00> : vector<1x128xf32>
    %133 = tpu.matmul %132, %131, %cst_42 {dimension_numbers = #tpu.dot_dimension_numbers<[1], [0], [0], [1], [0, 0, 1, 1], [], []>} : vector<1x16xf32>, vector<16x128xf32>, vector<1x128xf32> -> vector<1x128xf32>
    %c3_43 = arith.constant 3 : index
    %c0_44 = arith.constant 0 : index
    %134 = vector.load %arg11[%c3_43, %c0_44] : memref<8x128xf32, #tpu.memory_space<vmem>>, vector<1x128xf32>
    tpu.vector_store %arg11[%c3_43, %c0_44], %133 {strides = array<i32>} : memref<8x128xf32, #tpu.memory_space<vmem>>, vector<1x128xf32>,
    %135 = vector.extract_strided_slice %74 {offsets = [4, 0], sizes = [1, 16], strides = [1, 1]} : vector<8x16xf32> to vector<1x16xf32>
    %136 = vector.extract_strided_slice %93 {offsets = [4, 0], sizes = [1, 128], strides = [1, 1]} : vector<8x128xf32> to vector<1x128xf32>
    %cst_45 = arith.constant dense<0.000000e+00> : vector<16x128xf32>
    %137 = tpu.matmul %135, %136, %cst_45 {dimension_numbers = #tpu.dot_dimension_numbers<[0], [0], [1], [1], [0, 1, 1, 1], [], []>} : vector<1x16xf32>, vector<1x128xf32>, vector<16x128xf32> -> vector<16x128xf32>
    %138 = vector.extract_strided_slice %92 {offsets = [4, 0], sizes = [1, 128], strides = [1, 1]} : vector<8x128xf32> to vector<1x128xf32>
    %139 = vector.broadcast %138 : vector<1x128xf32> to vector<16x128xf32>
    %140 = arith.mulf %131, %139 : vector<16x128xf32>
    %141 = arith.addf %140, %137 : vector<16x128xf32>
    %142 = vector.extract_strided_slice %75 {offsets = [4, 0], sizes = [1, 16], strides = [1, 1]} : vector<8x16xf32> to vector<1x16xf32>
    %cst_46 = arith.constant dense<0.000000e+00> : vector<1x128xf32>
    %143 = tpu.matmul %142, %141, %cst_46 {dimension_numbers = #tpu.dot_dimension_numbers<[1], [0], [0], [1], [0, 0, 1, 1], [], []>} : vector<1x16xf32>, vector<16x128xf32>, vector<1x128xf32> -> vector<1x128xf32>
    %c4 = arith.constant 4 : index
    %c0_47 = arith.constant 0 : index
    %144 = vector.load %arg11[%c4, %c0_47] : memref<8x128xf32, #tpu.memory_space<vmem>>, vector<1x128xf32>
    tpu.vector_store %arg11[%c4, %c0_47], %143 {strides = array<i32>} : memref<8x128xf32, #tpu.memory_space<vmem>>, vector<1x128xf32>,
    %145 = vector.extract_strided_slice %74 {offsets = [5, 0], sizes = [1, 16], strides = [1, 1]} : vector<8x16xf32> to vector<1x16xf32>
    %146 = vector.extract_strided_slice %93 {offsets = [5, 0], sizes = [1, 128], strides = [1, 1]} : vector<8x128xf32> to vector<1x128xf32>
    %cst_48 = arith.constant dense<0.000000e+00> : vector<16x128xf32>
    %147 = tpu.matmul %145, %146, %cst_48 {dimension_numbers = #tpu.dot_dimension_numbers<[0], [0], [1], [1], [0, 1, 1, 1], [], []>} : vector<1x16xf32>, vector<1x128xf32>, vector<16x128xf32> -> vector<16x128xf32>
    %148 = vector.extract_strided_slice %92 {offsets = [5, 0], sizes = [1, 128], strides = [1, 1]} : vector<8x128xf32> to vector<1x128xf32>
    %149 = vector.broadcast %148 : vector<1x128xf32> to vector<16x128xf32>
    %150 = arith.mulf %141, %149 : vector<16x128xf32>
    %151 = arith.addf %150, %147 : vector<16x128xf32>
    %152 = vector.extract_strided_slice %75 {offsets = [5, 0], sizes = [1, 16], strides = [1, 1]} : vector<8x16xf32> to vector<1x16xf32>
    %cst_49 = arith.constant dense<0.000000e+00> : vector<1x128xf32>
    %153 = tpu.matmul %152, %151, %cst_49 {dimension_numbers = #tpu.dot_dimension_numbers<[1], [0], [0], [1], [0, 0, 1, 1], [], []>} : vector<1x16xf32>, vector<16x128xf32>, vector<1x128xf32> -> vector<1x128xf32>
    %c5 = arith.constant 5 : index
    %c0_50 = arith.constant 0 : index
    %154 = vector.load %arg11[%c5, %c0_50] : memref<8x128xf32, #tpu.memory_space<vmem>>, vector<1x128xf32>
    tpu.vector_store %arg11[%c5, %c0_50], %153 {strides = array<i32>} : memref<8x128xf32, #tpu.memory_space<vmem>>, vector<1x128xf32>,
    %155 = vector.extract_strided_slice %74 {offsets = [6, 0], sizes = [1, 16], strides = [1, 1]} : vector<8x16xf32> to vector<1x16xf32>
    %156 = vector.extract_strided_slice %93 {offsets = [6, 0], sizes = [1, 128], strides = [1, 1]} : vector<8x128xf32> to vector<1x128xf32>
    %cst_51 = arith.constant dense<0.000000e+00> : vector<16x128xf32>
    %157 = tpu.matmul %155, %156, %cst_51 {dimension_numbers = #tpu.dot_dimension_numbers<[0], [0], [1], [1], [0, 1, 1, 1], [], []>} : vector<1x16xf32>, vector<1x128xf32>, vector<16x128xf32> -> vector<16x128xf32>
    %158 = vector.extract_strided_slice %92 {offsets = [6, 0], sizes = [1, 128], strides = [1, 1]} : vector<8x128xf32> to vector<1x128xf32>
    %159 = vector.broadcast %158 : vector<1x128xf32> to vector<16x128xf32>
    %160 = arith.mulf %151, %159 : vector<16x128xf32>
    %161 = arith.addf %160, %157 : vector<16x128xf32>
    %162 = vector.extract_strided_slice %75 {offsets = [6, 0], sizes = [1, 16], strides = [1, 1]} : vector<8x16xf32> to vector<1x16xf32>
    %cst_52 = arith.constant dense<0.000000e+00> : vector<1x128xf32>
    %163 = tpu.matmul %162, %161, %cst_52 {dimension_numbers = #tpu.dot_dimension_numbers<[1], [0], [0], [1], [0, 0, 1, 1], [], []>} : vector<1x16xf32>, vector<16x128xf32>, vector<1x128xf32> -> vector<1x128xf32>
    %c6 = arith.constant 6 : index
    %c0_53 = arith.constant 0 : index
    %164 = vector.load %arg11[%c6, %c0_53] : memref<8x128xf32, #tpu.memory_space<vmem>>, vector<1x128xf32>
    tpu.vector_store %arg11[%c6, %c0_53], %163 {strides = array<i32>} : memref<8x128xf32, #tpu.memory_space<vmem>>, vector<1x128xf32>,
    %165 = vector.extract_strided_slice %74 {offsets = [7, 0], sizes = [1, 16], strides = [1, 1]} : vector<8x16xf32> to vector<1x16xf32>
    %166 = vector.extract_strided_slice %93 {offsets = [7, 0], sizes = [1, 128], strides = [1, 1]} : vector<8x128xf32> to vector<1x128xf32>
    %cst_54 = arith.constant dense<0.000000e+00> : vector<16x128xf32>
    %167 = tpu.matmul %165, %166, %cst_54 {dimension_numbers = #tpu.dot_dimension_numbers<[0], [0], [1], [1], [0, 1, 1, 1], [], []>} : vector<1x16xf32>, vector<1x128xf32>, vector<16x128xf32> -> vector<16x128xf32>
    %168 = vector.extract_strided_slice %92 {offsets = [7, 0], sizes = [1, 128], strides = [1, 1]} : vector<8x128xf32> to vector<1x128xf32>
    %169 = vector.broadcast %168 : vector<1x128xf32> to vector<16x128xf32>
    %170 = arith.mulf %161, %169 : vector<16x128xf32>
    %171 = arith.addf %170, %167 : vector<16x128xf32>
    %172 = vector.extract_strided_slice %75 {offsets = [7, 0], sizes = [1, 16], strides = [1, 1]} : vector<8x16xf32> to vector<1x16xf32>
    %cst_55 = arith.constant dense<0.000000e+00> : vector<1x128xf32>
    %173 = tpu.matmul %172, %171, %cst_55 {dimension_numbers = #tpu.dot_dimension_numbers<[1], [0], [0], [1], [0, 0, 1, 1], [], []>} : vector<1x16xf32>, vector<16x128xf32>, vector<1x128xf32> -> vector<1x128xf32>
    %c7 = arith.constant 7 : index
    %c0_56 = arith.constant 0 : index
    %174 = vector.load %arg11[%c7, %c0_56] : memref<8x128xf32, #tpu.memory_space<vmem>>, vector<1x128xf32>
    tpu.vector_store %arg11[%c7, %c0_56], %173 {strides = array<i32>} : memref<8x128xf32, #tpu.memory_space<vmem>>, vector<1x128xf32>,
    %c0_57 = arith.constant 0 : index
    %c0_58 = arith.constant 0 : index
    %175 = vector.load %arg11[%c0_57, %c0_58] : memref<8x128xf32, #tpu.memory_space<vmem>>, vector<8x128xf32>
    %c0_59 = arith.constant 0 : index
    %c0_60 = arith.constant 0 : index
    %176 = vector.load %arg7[%c0_59, %c0_60] : memref<1x128xf32, #tpu.memory_space<vmem>>, vector<1x128xf32>
    %177 = vector.broadcast %176 : vector<1x128xf32> to vector<8x128xf32>
    %178 = arith.mulf %177, %73 : vector<8x128xf32>
    %179 = arith.addf %175, %178 : vector<8x128xf32>
    %180 = arith.negf %18 : vector<8x128xf32>
    %181 = math.exp %180 : vector<8x128xf32>
    %cst_61 = arith.constant 1.000000e+00 : f32
    %182 = vector.broadcast %cst_61 : f32 to vector<8x128xf32>
    %183 = arith.addf %182, %181 : vector<8x128xf32>
    %184 = arith.divf %182, %183 : vector<8x128xf32>
    %185 = arith.mulf %18, %184 : vector<8x128xf32>
    %186 = arith.mulf %179, %185 : vector<8x128xf32>
    %c0_62 = arith.constant 0 : index
    %c0_63 = arith.constant 0 : index
    %187 = vector.load %arg8[%c0_62, %c0_63] : memref<1x128xf32, #tpu.memory_space<vmem>>, vector<1x128xf32>
    %188 = arith.mulf %186, %186 : vector<8x128xf32>
    %cst_64 = arith.constant dense<0.000000e+00> : vector<8xf32>
    %189 = vector.multi_reduction <add>, %188, %cst_64 [1] : vector<8x128xf32> to vector<8xf32>
    %190 = vector.shape_cast %189 : vector<8xf32> to vector<8x1xf32>
    %cst_65 = arith.constant 1.280000e+02 : f32
    %191 = vector.broadcast %cst_65 : f32 to vector<8x1xf32>
    %192 = arith.divf %190, %191 : vector<8x1xf32>
    %cst_66 = arith.constant 9.99999997E-7 : f32
    %193 = vector.broadcast %cst_66 : f32 to vector<8x1xf32>
    %194 = arith.addf %192, %193 : vector<8x1xf32>
    %195 = math.rsqrt %194 : vector<8x1xf32>
    %196 = vector.broadcast %195 : vector<8x1xf32> to vector<8x128xf32>
    %197 = arith.mulf %186, %196 : vector<8x128xf32>
    %198 = vector.broadcast %187 : vector<1x128xf32> to vector<8x128xf32>
    %199 = arith.mulf %197, %198 : vector<8x128xf32>
    %c0_67 = arith.constant 0 : index
    %c0_68 = arith.constant 0 : index
    %200 = vector.load %arg9[%c0_67, %c0_68] : memref<128x64xf32, #tpu.memory_space<vmem>>, vector<128x64xf32>
    %201 = arith.truncf %199 : vector<8x128xf32> to vector<8x128xbf16>
    %202 = arith.truncf %200 : vector<128x64xf32> to vector<128x64xbf16>
    %cst_69 = arith.constant dense<0.000000e+00> : vector<8x64xf32>
    %203 = tpu.matmul %201, %202, %cst_69 {dimension_numbers = #tpu.dot_dimension_numbers<[1], [0], [0], [1], [0, 0, 1, 1], [], []>} : vector<8x128xbf16>, vector<128x64xbf16>, vector<8x64xf32> -> vector<8x64xf32>
    %cst_70 = arith.constant 2.200000e-01 : f32
    %204 = vector.broadcast %cst_70 : f32 to vector<8x64xf32>
    %205 = arith.mulf %204, %203 : vector<8x64xf32>
    %206 = arith.addf %0, %205 : vector<8x64xf32>
    %c0_71 = arith.constant 0 : index
    %c0_72 = arith.constant 0 : index
    %207 = vector.load %arg10[%c0_71, %c0_72] : memref<8x64xf32, #tpu.memory_space<vmem>>, vector<8x64xf32>
    tpu.vector_store %arg10[%c0_71, %c0_72], %206 {strides = array<i32>} : memref<8x64xf32, #tpu.memory_space<vmem>>, vector<8x64xf32>,
    return
  }
}

</mosaic_0001>

<bundles_post_ra>
// kernel: tpu_custom_call.1
= control target key start
LH: loop header
LB: loop body
LE: loop exit
PB: predicated region body
PF: predicated region fallthrough
CT: control target
= control target key end

     0   :  { %15 = vsyncpa [#allocation4], 0  ;;  %s3580_s0 = inlined_call_operand.vmem [shape: f32[8,64], index: 0, kind: input, shape index: {}]   ;;  %s3581_s1 = inlined_call_operand.vmem [shape: f32[1,64], index: 1, kind: input, shape index: {}]   ;;  %s3582_s2 = inlined_call_operand.hbm [shape: f32[64,416], index: 2, kind: input, shape index: {}]   ;;  %s3583_s3 = inlined_call_operand.vmem [shape: f32[4,160], index: 3, kind: input, shape index: {}]   ;;  %s3584_s4 = inlined_call_operand.vmem [shape: f32[1,160], index: 4, kind: input, shape index: {}]   ;;  %s3585_s5 = inlined_call_operand.vmem [shape: f32[1,128], index: 5, kind: input, shape index: {}]   ;;  %s3586_s6 = inlined_call_operand.vmem [shape: f32[1,128], index: 6, kind: input, shape index: {}]   ;;  %s3587_s7 = inlined_call_operand.vmem [shape: f32[1,128], index: 7, kind: input, shape index: {}]   ;;  %s3588_s8 = inlined_call_operand.vmem [shape: f32[1,128], index: 8, kind: input, shape index: {}]   ;;  %s3589_s9 = inlined_call_operand.vmem [shape: f32[128,64], index: 9, kind: input, shape index: {}]   ;;  %s3590_s10 = inlined_call_operand.hbm [shape: f32[8,64], index: 10, kind: output, shape index: {}]  }
   0x1   :  { %16 = vsyncpa [#allocation5], 0  ;;  %s3110_s13 = smov [#allocation3]   ;;  %s3062_s17 = scalar_lea.hbm %s3582_s2, 4096 }
   0x2   :  { %s26_s14 = sshll.u32 %s3110_s13, 4  ;;  %p3063_p0 = scmp.ne.s32.totalorder %s3582_s2, %s3062_s17  ;;  %s27_s14 = int_to_ptr.vmem [resolvable:$true] %s26_s14 }
   0x3   :  { %p3066_p1 = scmp.lt.u32.totalorder %s3062_s17, %s3582_s2 }
   0x5   :  { %p3068_p2 = pnand %p3066_p1, %p3063_p0 }
   0x7   :  { %3071 = shalt.err (!%p3068_p2)
}
   0x8   :  { %s3072_s22 = scalar_lea.vmem %s27_s14, 4096  ;;  %p3077_p4 = scmp.lt.s32.totalorder %s27_s14, %s27_s14 }
   0x9   :  { %p3073_p3 = scmp.ne.s32.totalorder %s27_s14, %s3072_s22  ;;  %p3078_p5 = scmp.lt.s32.totalorder %s3072_s22, %s3072_s22 }
   0xb   :  { %p3079_p6 = por %p3078_p5, %p3077_p4 }
   0xd   :  { %p3080_p7 = pnand %p3079_p6, %p3073_p3 }
   0xf   :  { %3083 = shalt.err (!%p3080_p7)
}
  0x10   :  { %s3111_s23 = smov 512   ;;  %s3112_s24 = smov 32  }
  0x11   :  { %32 = dma.hbm_to_vmem [thread:$0]  %s3582_s2, 4096, %s27_s14, [#allocation4], %s3111_s23, %s3111_s23, %s3112_s24  }
  0x12   :  { %3106 = dma.done.wait [#allocation4], 4096  }
  0x13   :  { %3107 = vsyncadd [#allocation4], 4294963200  ;;  %v51_v0 = vld [vmem:[%s3580_s0] sm:$0xff]  ;;  %vm54_vm0 = vcmask 523264   ;;  %v71_v3 = vld [vmem:[#allocation3 + $0x8] sm:$0xff]  ;;  %v3113_v16 = vmov 0  }
  0x14   :  { %v53_v1 = vmul.f32 %v51_v0, %v51_v0  ;;  %v75_v4 = vld [vmem:[#allocation3 + $0x28] sm:$0xff]  ;;  %v70_v6 = vld [vmem:[#allocation3] sm:$0xff]  ;;  %154 = vmatprep.mubr.bf16.mxu1 %v3113_v16  ;;  %v73_v27 = vld [vmem:[#allocation3 + $0x18] sm:$0xff]  ;;  %v3114_v61 = vmov 0.0   ;;  %vm212_vm3 = vcmask 64512   ;;  %vm703_vm6 = vcmask 7168  }
  0x15   :  { %v104_v5 = vpack.c.bf16 %v75_v4, %v71_v3  ;;  %v74_v7 = vld [vmem:[#allocation3 + $0x20] sm:$0xff]  ;;  %v79_v9 = vld [vmem:[#allocation3 + $0x48] sm:$0xff]  ;;  %v77_v28 = vld [vmem:[#allocation3 + $0x38] sm:$0xff]  ;;  %280 = vmatprep.mubr.f32.mxu0 %v3114_v61  ;;  %vm701_vm7 = vcmask 785408   ;;  %vm710_vm8 = vcmask 1040384   ;;  %vm3118_vm9 = vmmov 0  }
  0x16   :  { %v55_v2 = vsel %vm54_vm0, %v53_v1, 0.0  ;;  %v103_v8 = vpack.c.bf16 %v74_v7, %v70_v6  ;;  %v83_v10 = vld [vmem:[#allocation3 + $0x68] sm:$0xff]  ;;  %v78_v11 = vld [vmem:[#allocation3 + $0x40] sm:$0xff]  ;;  %v106_v30 = vpack.c.bf16 %v77_v28, %v73_v27  ;;  %v2709_v31 = vld [vmem:[%s3586_s6] ss:$0 sm:$0xff]  ;;  %vm829_vm10 = vcmask 130048  }
  0x17   :  { %56 = vadd.xlane.f32.xlu0 %v55_v2  ;;  %122 = vmatprep.subr.bf16.mxu1 %v104_v5  ;;  %v108_v12 = vpack.c.bf16 %v83_v10, %v79_v9  ;;  %v82_v13 = vld [vmem:[#allocation3 + $0x60] sm:$0xff]  ;;  %v87_v14 = vld [vmem:[#allocation3 + $0x88] sm:$0xff]  ;;  %v2693_v36 = vld [vmem:[%s3581_s1] ss:$0 sm:$0xff] }
  0x18   :  { %123 = vmatpush1.bf16.msra.mxu1 %v103_v8  ;;  %v91_v15 = vld [vmem:[#allocation3 + $0xa8] sm:$0xff]  ;;  %v107_v17 = vpack.c.bf16 %v82_v13, %v78_v11  ;;  %v86_v19 = vld [vmem:[#allocation3 + $0x80] sm:$0xff]  ;;  %v72_v38 = vld [vmem:[#allocation3 + $0x10] sm:$0xff] }
  0x19   :  { %v112_v18 = vpack.c.bf16 %v91_v15, %v87_v14  ;;  %v90_v20 = vld [vmem:[#allocation3 + $0xa0] sm:$0xff]  ;;  %124 = vmatprep.subr.bf16.mxu1 %v108_v12  ;;  %v95_v21 = vld [vmem:[#allocation3 + $0xc8] sm:$0xff]  ;;  %v76_v39 = vld [vmem:[#allocation3 + $0x30] sm:$0xff] }
  0x1a   :  { %v99_v22 = vld [vmem:[#allocation3 + $0xe8] sm:$0xff]  ;;  %v111_v23 = vpack.c.bf16 %v90_v20, %v86_v19  ;;  %v94_v25 = vld [vmem:[#allocation3 + $0xc0] sm:$0xff]  ;;  %v81_v40 = vld [vmem:[#allocation3 + $0x58] sm:$0xff]  ;;  %v105_v43 = vpack.c.bf16 %v76_v39, %v72_v38 }
  0x1b   :  { %v116_v24 = vpack.c.bf16 %v99_v22, %v95_v21  ;;  %v98_v26 = vld [vmem:[#allocation3 + $0xe0] sm:$0xff]  ;;  %v85_v41 = vld [vmem:[#allocation3 + $0x78] sm:$0xff]  ;;  %v80_v46 = vld [vmem:[#allocation3 + $0x50] sm:$0xff] }
  0x1c   :  { %125 = vmatpush1.bf16.msra.mxu1 %v107_v17  ;;  %v115_v29 = vpack.c.bf16 %v98_v26, %v94_v25  ;;  %v110_v45 = vpack.c.bf16 %v85_v41, %v81_v40  ;;  %v84_v47 = vld [vmem:[#allocation3 + $0x70] sm:$0xff]  ;;  %v89_v48 = vld [vmem:[#allocation3 + $0x98] sm:$0xff] }
  0x1d   :  { %126 = vmatprep.subr.bf16.mxu1 %v112_v18  ;;  %v93_v49 = vld [vmem:[#allocation3 + $0xb8] sm:$0xff]  ;;  %v109_v50 = vpack.c.bf16 %v84_v47, %v80_v46  ;;  %v88_v52 = vld [vmem:[#allocation3 + $0x90] sm:$0xff] }
  0x1e   :  { %v114_v51 = vpack.c.bf16 %v93_v49, %v89_v48  ;;  %v92_v53 = vld [vmem:[#allocation3 + $0xb0] sm:$0xff]  ;;  %v97_v54 = vld [vmem:[#allocation3 + $0xd8] sm:$0xff] }
  0x1f   :  { %v101_v55 = vld [vmem:[#allocation3 + $0xf8] sm:$0xff]  ;;  %v113_v56 = vpack.c.bf16 %v92_v53, %v88_v52  ;;  %v96_v58 = vld [vmem:[#allocation3 + $0xd0] sm:$0xff] }
  0x20   :  { %127 = vmatpush1.bf16.msra.mxu1 %v111_v23  ;;  %v118_v57 = vpack.c.bf16 %v101_v55, %v97_v54  ;;  %v100_v59 = vld [vmem:[#allocation3 + $0xf0] sm:$0xff]  ;;  %v2698_v15 = vld [vmem:[%s3583_s3 + $0x3] ss:$4 sm:$0x3]  ;;  %v585_v38 = vld [vmem:[%s3584_s4] sm:$0x3] }
  0x21   :  { %128 = vmatprep.subr.bf16.mxu1 %v116_v24  ;;  %v117_v60 = vpack.c.bf16 %v100_v59, %v96_v58  ;;  %v2701_v17 = vld [vmem:[%s3583_s3 + $0x2] ss:$4 sm:$0x3]  ;;  %v2704_v21 = vld [vmem:[%s3583_s3 + $0x1] ss:$4 sm:$0x3] }
  0x22   :  { %v569_v23 = vld [vmem:[%s3583_s3] ss:$4 sm:$0x3]  ;;  %s3115_s4 = smov 96  }
  0x24   :  { %129 = vmatpush1.bf16.msra.mxu1 %v115_v29 }
  0x25   :  { %163 = vmatprep.subr.bf16.mxu1 %v106_v30 }
  0x2d   :  { %619 = vrot.lane.b32.xlu0 %v2709_v31, %s3112_s24 }
  0xa4   :  { %v57_v32 = vpop.xlane.xlu0 %56 }
  0xa5   :  { %v59_v33 = vmul.f32 0.015625, %v57_v32 }
  0xa7   :  { %v60_v34 = vadd.f32 1e-06, %v59_v33 }
  0xa9   :  { %3033 = vrsqrt.f32 %v60_v34 }
  0xb3   :  { %v3034_v35 = vpop.eup %3033 }
  0xb4   :  { %v62_v37 = vmul.f32 %v3034_v35, %v51_v0  ;;  %v204_v0 = vlaneseq }
  0xb6   :  { %v69_v42 = vmul.f32 %v2693_v36, %v62_v37  ;;  %v3205_v3 = vshrl.u32 %v204_v0, 7  ;;  %v207_v4 = vand.u32 127, %v204_v0 }
  0xb8   :  { %v102_v44 = vpack.c.bf16 %v69_v42, %v69_v42  ;;  %v208_v5 = vsub.s32 %v3205_v3, %v207_v4  ;;  %v3227_v14 = vsub.s32 0, %v3205_v3 }
  0xba   :  { %2694 = vmatmul.mubr.msk.bf16.vlgmr.msra.gmra.mrb[0].mxu1 %vm54_vm0, %v102_v44  ;;  %vm209_vm1 = vcmp.eq.s32.totalorder %v208_v5, 0  ;;  %vm304_vm2 = vcmp.eq.s32.totalorder %v208_v5, 1  ;;  %vm398_vm4 = vcmp.eq.s32.totalorder %v208_v5, 2  ;;  %vm492_vm5 = vcmp.eq.s32.totalorder %v208_v5, 3 }
  0xbb   :  { %164 = vmatpush1.bf16.msra.mxu1 %v105_v43  ;;  %195 = vmatprep.mubr.bf16.mxu1 %v3113_v16  ;;  %v2696_v7 = vsel %vm209_vm1, 1.0, %v3114_v61  ;;  %v2699_v9 = vsel %vm304_vm2, 1.0, %v3114_v61  ;;  %v2702_v12 = vsel %vm398_vm4, 1.0, %v3114_v61  ;;  %v2705_v13 = vsel %vm492_vm5, 1.0, %v3114_v61 }
  0xbc   :  { %165 = vmatprep.subr.bf16.mxu1 %v110_v45  ;;  %v3233_v16 = vsub.s32 1, %v3205_v3  ;;  %v293_v18 = vrot.slane %v2698_v15, %v3227_v14  ;;  %v387_v19 = vrot.slane %v2701_v17, %v3227_v14  ;;  %v481_v28 = vrot.slane %v2704_v21, %v3227_v14 }
  0xbd   :  { %v574_v33 = vrot.slane %v569_v23, %v3227_v14  ;;  %v590_v48 = vrot.slane %v585_v38, %v3227_v14 }
  0xbe   :  { %v297_v20 = vrot.slane %v2698_v15, %v3233_v16  ;;  %v391_v22 = vrot.slane %v2701_v17, %v3233_v16  ;;  %v485_v32 = vrot.slane %v2704_v21, %v3233_v16  ;;  %v578_v35 = vrot.slane %v569_v23, %v3233_v16 }
  0xbf   :  { %166 = vmatpush1.bf16.msra.mxu1 %v109_v50  ;;  %v594_v50 = vrot.slane %v585_v38, %v3233_v16 }
  0xc0   :  { %167 = vmatprep.subr.bf16.mxu1 %v114_v51 }
  0xc3   :  { %168 = vmatpush1.bf16.msra.mxu1 %v113_v56 }
  0xc4   :  { %169 = vmatprep.subr.bf16.mxu1 %v118_v57 }
  0xc7   :  { %170 = vmatpush1.bf16.msra.mxu1 %v117_v60 }
  0xca   :  { %2695 = vmatmul.mubr.msk.bf16.vlgmr.msra.gmra.mrb[4].mxu1 %vm54_vm0, %v102_v44 }
  0xcb   :  { %374 = vmatprep.mubr.f32.mxu1 %v3114_v61 }
 0x18d   :  { %v3203_v62 = vpop.f32.mrb[0].mxu1 }
 0x18e   :  { %v158_v63 = vpop.f32.mrb[1].mxu1 }
 0x18f   :  { %v160_v1 = vpop.f32.mrb[2].mxu1 }
 0x190   :  { %v161_v2 = vpop.f32.mrb[3].mxu1 }
 0x19d   :  { %v3208_v6 = vpop.f32.mrb[4].mxu1 }
 0x19e   :  { %v3211_v8 = vpop.f32.mrb[5].mxu1  ;;  %216 = vmatprep.subr.mxu0 %v3208_v6  ;;  %310 = vmatprep.subr.mxu1 %v3208_v6 }
 0x19f   :  { %v201_v10 = vpop.f32.mrb[6].mxu1  ;;  %217 = vmatpush1.msra.mxu0 %v158_v63  ;;  %311 = vmatpush1.msra.mxu1 %v158_v63 }
 0x1a0   :  { %v202_v11 = vpop.f32.mrb[7].mxu1  ;;  %2697 = vmatmul.mubr.msk.f32.vlgmr.msra.gmra.mrb[0].mxu0 %vm212_vm3, %v2696_v7  ;;  %404 = vmatprep.subr.mxu0 %v3208_v6  ;;  %v620_v7 = vpop.permute.xlu0 %619 }
 0x1a1   :  { %498 = vmatprep.subr.mxu1 %v3208_v6  ;;  %2700 = vmatmul.mubr.msk.f32.vlgmr.msra.gmra.mrb[8].mxu1 %vm212_vm3, %v2699_v9  ;;  %v622_v9 = vadd.f32 %v620_v7, %v3208_v6  ;;  %v623_v11 = vadd.f32 %v620_v7, %v3211_v8 }
 0x1a2   :  { %405 = vmatpush1.msra.mxu0 %v158_v63  ;;  %499 = vmatpush1.msra.mxu1 %v158_v63 }
 0x1a3   :  { %468 = vmatprep.mubr.f32.mxu0 %v3114_v61  ;;  %562 = vmatprep.mubr.f32.mxu1 %v3114_v61  ;;  %v626_v10 = vand.u32 2147483647, %v622_v9  ;;  %v624_v6 = vmax.f32 %v622_v9, 0.0 }
 0x1a4   :  { %2703 = vmatmul.mubr.msk.f32.vlgmr.msra.gmra.mrb[2].mxu0 %vm212_vm3, %v2702_v12 }
 0x1a5   :  { %2706 = vmatmul.mubr.msk.f32.vlgmr.msra.gmra.mrb[10].mxu1 %vm212_vm3, %v2705_v13  ;;  %v628_v12 = vsub.f32 0.0, %v626_v10  ;;  %v627_v13 = vand.u32 2147483647, %v623_v11 }
 0x1a6   :  { %2812 = vmatprep.mubr.msk.f32.mxu1 %vm3118_vm9, %v3114_v61 }
 0x1a7   :  { %v630_v15 = vmul.f32 1.442695, %v628_v12  ;;  %v629_v17 = vsub.f32 0.0, %v627_v13 }
 0x273   :  { %v282_v24 = vpop.f32.mrb[0].mxu0 }
 0x274   :  { %v300_v25 = vmul.f32 %v293_v18, %v282_v24  ;;  %v376_v26 = vpop.f32.mrb[8].mxu1  ;;  %v284_v27 = vpop.f32.mrb[1].mxu0  ;;  %v632_v18 = vmul.f32 1.442695, %v629_v17 }
 0x275   :  { %v394_v29 = vmul.f32 %v387_v19, %v376_v26  ;;  %v301_v30 = vmul.f32 %v297_v20, %v284_v27  ;;  %v378_v31 = vpop.f32.mrb[9].mxu1 }
 0x276   :  { %v395_v34 = vmul.f32 %v391_v22, %v378_v31 }
 0x277   :  { %v396_v36 = vadd.f32 %v394_v29, %v300_v25  ;;  %v470_v37 = vpop.f32.mrb[2].mxu0 }
 0x278   :  { %v397_v39 = vadd.f32 %v395_v34, %v301_v30  ;;  %v488_v40 = vmul.f32 %v481_v28, %v470_v37  ;;  %v472_v41 = vpop.f32.mrb[3].mxu0  ;;  %v564_v42 = vpop.f32.mrb[10].mxu1  ;;  %v625_v28 = vmax.f32 %v623_v11, 0.0 }
 0x279   :  { %v489_v43 = vmul.f32 %v485_v32, %v472_v41  ;;  %v581_v44 = vmul.f32 %v574_v33, %v564_v42  ;;  %v566_v45 = vpop.f32.mrb[11].mxu1 }
 0x27a   :  { %v490_v46 = vadd.f32 %v488_v40, %v396_v36  ;;  %v582_v47 = vmul.f32 %v578_v35, %v566_v45 }
 0x27b   :  { %v491_v49 = vadd.f32 %v489_v43, %v397_v39 }
 0x27c   :  { %v583_v51 = vadd.f32 %v581_v44, %v490_v46 }
 0x27d   :  { %v584_v52 = vadd.f32 %v582_v47, %v491_v49 }
 0x27e   :  { %v597_v53 = vadd.f32 %v590_v48, %v583_v51 }
 0x27f   :  { %v598_v54 = vadd.f32 %v594_v50, %v584_v52  ;;  %v2710_v52 = vld [vmem:[%s3585_s5] ss:$0 sm:$0xff]  ;;  %s3116_s5 = smov 112  }
 0x280   :  { %v2707_v55 = vmul.f32 -1.442695, %v597_v53 }
 0x281   :  { %v2708_v56 = vmul.f32 -1.442695, %v598_v54 }
 0x282   :  { %3035 = vpow2.f32 %v2707_v55 }
 0x283   :  { %3037 = vpow2.f32 %v2708_v56 }
 0x28c   :  { %v3036_v57 = vpop.eup %3035 }
 0x28d   :  { %v3038_v58 = vpop.eup %3037  ;;  %v605_v59 = vadd.f32 1.0, %v3036_v57 }
 0x28e   :  { %v606_v60 = vadd.f32 1.0, %v3038_v58 }
 0x28f   :  { %3039 = vrcp.f32 %v605_v59 }
 0x290   :  { %3041 = vrcp.f32 %v606_v60 }
 0x291   :  { %3043 = vpow2.f32 %v630_v15 }
 0x292   :  { %3045 = vpow2.f32 %v632_v18 }
 0x299   :  { %v3040_v63 = vpop.eup %3039 }
 0x29a   :  { %v3042_v0 = vpop.eup %3041  ;;  %v3257_v1 = vmul.f32 %v3040_v63, %v597_v53 }
 0x29b   :  { %v3259_v2 = vmul.f32 %v3042_v0, %v598_v54  ;;  %v3044_v19 = vpop.eup %3043 }
 0x29c   :  { %658 = vrot.lane.b32.xlu1 %v3257_v1, %s3112_s24  ;;  %v634_v20 = vadd.f32 1.0, %v3044_v19  ;;  %v3046_v21 = vpop.eup %3045 }
 0x29d   :  { %663 = vxpose.xlu0.b32.start.end [1/1] (short) (narrow) %v3259_v2, 16  ;;  %v1142_v4 = vrot.slane %v3259_v2, 2  ;;  %v903_v5 = vrot.slane %v3259_v2, 1  ;;  %v635_v22 = vadd.f32 1.0, %v3046_v21  ;;  %v1620_v46 = vrot.slane %v3259_v2, 4 }
 0x29e   :  { %3047 = vlog2.f32 %v634_v20  ;;  %v1859_v48 = vrot.slane %v3259_v2, 5  ;;  %v2098_v49 = vrot.slane %v3259_v2, 6  ;;  %v2337_v50 = vrot.slane %v3259_v2, 7 }
 0x29f   :  { %3049 = vlog2.f32 %v635_v22  ;;  %v1381_v51 = vrot.slane %v3259_v2, 3 }
 0x2a2   :  { %1144 = vxpose.xlu0.b32.start.end [1/1] (short) (narrow) %v1142_v4, 16 }
 0x2a8   :  { %v3048_v23 = vpop.eup %3047 }
 0x2a9   :  { %v637_v24 = vmul.f32 0.6931472, %v3048_v23  ;;  %v3050_v25 = vpop.eup %3049 }
 0x2aa   :  { %v639_v26 = vmul.f32 0.6931472, %v3050_v25 }
 0x2ab   :  { %v3272_v27 = vadd.f32 %v637_v24, %v624_v6 }
 0x2ac   :  { %v3275_v30 = vadd.f32 %v639_v26, %v625_v28 }
 0x2c5   :  { %905 = vxpose.xlu1.b32.start.end [1/1] (short) (narrow) %v903_v5, 16 }
 0x30e   :  { %v659_v8 = vpop.permute.xlu1 %658 }
 0x30f   :  { %v661_v29 = vmul.f32 %v659_v8, %v3272_v27  ;;  %v662_v32 = vmul.f32 %v659_v8, %v3275_v30 }
 0x311   :  { %697 = vrot.lane.b32.xlu1 %v661_v29, %s3115_s4  ;;  %v1415_v31 = vrot.slane %v661_v29, 3  ;;  %v1654_v33 = vrot.slane %v661_v29, 4  ;;  %v937_v34 = vrot.slane %v661_v29, 1  ;;  %v1893_v35 = vrot.slane %v661_v29, 5 }
 0x312   :  { %v938_v36 = vrot.slane %v662_v32, 1  ;;  %v2371_v37 = vrot.slane %v661_v29, 7  ;;  %v1176_v39 = vrot.slane %v661_v29, 2  ;;  %v1177_v40 = vrot.slane %v662_v32, 2 }
 0x313   :  { %1417 = vrot.lane.b32.xlu0 %v1415_v31, %s3115_s4  ;;  %v1416_v41 = vrot.slane %v662_v32, 3  ;;  %v1655_v42 = vrot.slane %v662_v32, 4  ;;  %v1894_v43 = vrot.slane %v662_v32, 5  ;;  %v2132_v44 = vrot.slane %v661_v29, 6 }
 0x314   :  { %v2133_v45 = vrot.slane %v662_v32, 6  ;;  %v2372_v47 = vrot.slane %v662_v32, 7 }
 0x315   :  { %699 = vrot.lane.b32.xlu1 %v662_v32, %s3115_s4 }
 0x317   :  { %1656 = vrot.lane.b32.xlu0 %v1654_v33, %s3115_s4 }
 0x319   :  { %939 = vrot.lane.b32.xlu1 %v937_v34, %s3115_s4 }
 0x31b   :  { %1895 = vrot.lane.b32.xlu0 %v1893_v35, %s3115_s4 }
 0x31d   :  { %941 = vrot.lane.b32.xlu1 %v938_v36, %s3115_s4  ;;  %v679_v38 = vpop.trf.xlu0 }
 0x31e   :  { %2805 = vmatprep.mubr.msk.f32.mxu0 %vm703_vm6, %v679_v38 }
 0x31f   :  { %2373 = vrot.lane.b32.xlu0 %v2371_v37, %s3115_s4 }
 0x321   :  { %1178 = vrot.lane.b32.xlu1 %v1176_v39, %s3115_s4  ;;  %v680_v56 = vpop.trf.xlu0 }
 0x325   :  { %1180 = vrot.lane.b32.xlu1 %v1177_v40, %s3115_s4  ;;  %v1160_v60 = vpop.trf.xlu0 }
 0x329   :  { %1419 = vrot.lane.b32.xlu1 %v1416_v41, %s3115_s4  ;;  %v1161_v7 = vpop.trf.xlu0 }
 0x32d   :  { %1658 = vrot.lane.b32.xlu1 %v1655_v42, %s3115_s4 }
 0x331   :  { %1897 = vrot.lane.b32.xlu1 %v1894_v43, %s3115_s4 }
 0x335   :  { %2134 = vrot.lane.b32.xlu1 %v2132_v44, %s3115_s4 }
 0x339   :  { %2136 = vrot.lane.b32.xlu1 %v2133_v45, %s3115_s4 }
 0x33d   :  { %1622 = vxpose.xlu0.b32.start.end [1/1] (short) (narrow) %v1620_v46, 16  ;;  %2375 = vrot.lane.b32.xlu1 %v2372_v47, %s3115_s4 }
 0x342   :  { %1861 = vxpose.xlu0.b32.start.end [1/1] (short) (narrow) %v1859_v48, 16 }
 0x345   :  { %v921_v53 = vpop.trf.xlu1 }
 0x347   :  { %2100 = vxpose.xlu0.b32.start.end [1/1] (short) (narrow) %v2098_v49, 16 }
 0x349   :  { %v922_v54 = vpop.trf.xlu1 }
 0x34c   :  { %2339 = vxpose.xlu0.b32.start.end [1/1] (short) (narrow) %v2337_v50, 16 }
 0x366   :  { %1383 = vxpose.xlu1.b32.start.end [1/1] (short) (narrow) %v1381_v51, 16 }
 0x379   :  { %648 = vrot.lane.b32.xlu0 %v2710_v52, %s3112_s24 }
 0x383   :  { %v698_v55 = vpop.permute.xlu1 %697 }
 0x385   :  { %v1418_v12 = vpop.permute.xlu0 %1417 }
 0x387   :  { %v700_v57 = vpop.permute.xlu1 %699 }
 0x388   :  { %v702_v58 = vsel %vm701_vm7, %v698_v55, %v700_v57 }
 0x389   :  { %2803 = vmatprep.subr.msk.mxu0 %vm710_vm8, %v702_v58  ;;  %v1657_v17 = vpop.permute.xlu0 %1656 }
 0x38a   :  { %2804 = vmatpush3.msk.msra.mxu0 %vm710_vm8, %v702_v58 }
 0x38b   :  { %v940_v59 = vpop.permute.xlu1 %939  ;;  %2806 = vmatmul.mubr.msk.f32.vlgmr.msra.gmra.mrb[4].mxu0 %vm703_vm6, %v680_v56 }
 0x38c   :  { %2817 = vmatprep.mubr.msk.f32.mxu0 %vm703_vm6, %v921_v53 }
 0x38d   :  { %v1896_v20 = vpop.permute.xlu0 %1895 }
 0x38f   :  { %v942_v63 = vpop.permute.xlu1 %941 }
 0x390   :  { %v943_v0 = vsel %vm701_vm7, %v940_v59, %v942_v63 }
 0x391   :  { %2815 = vmatprep.subr.msk.mxu0 %vm710_vm8, %v943_v0  ;;  %v2374_v21 = vpop.permute.xlu0 %2373 }
 0x392   :  { %2816 = vmatpush3.msk.msra.mxu0 %vm710_vm8, %v943_v0 }
 0x393   :  { %v1179_v9 = vpop.permute.xlu1 %1178  ;;  %2818 = vmatmul.mubr.msk.f32.vlgmr.msra.gmra.mrb[6].mxu0 %vm703_vm6, %v922_v54 }
 0x394   :  { %2829 = vmatprep.mubr.msk.f32.mxu0 %vm703_vm6, %v1160_v60 }
 0x397   :  { %v1181_v10 = vpop.permute.xlu1 %1180 }
 0x398   :  { %v1182_v11 = vsel %vm701_vm7, %v1179_v9, %v1181_v10 }
 0x399   :  { %2827 = vmatprep.subr.msk.mxu0 %vm710_vm8, %v1182_v11 }
 0x39a   :  { %2828 = vmatpush3.msk.msra.mxu0 %vm710_vm8, %v1182_v11 }
 0x39b   :  { %v1420_v13 = vpop.permute.xlu1 %1419  ;;  %2830 = vmatmul.mubr.msk.f32.vlgmr.msra.gmra.mrb[8].mxu0 %vm703_vm6, %v1161_v7 }
 0x39c   :  { %v1421_v15 = vsel %vm701_vm7, %v1418_v12, %v1420_v13 }
 0x39d   :  { %2839 = vmatprep.subr.msk.mxu0 %vm710_vm8, %v1421_v15 }
 0x39e   :  { %2840 = vmatpush3.msk.msra.mxu0 %vm710_vm8, %v1421_v15 }
 0x39f   :  { %v1659_v18 = vpop.permute.xlu1 %1658 }
 0x3a0   :  { %v1660_v19 = vsel %vm701_vm7, %v1657_v17, %v1659_v18 }
 0x3a1   :  { %2851 = vmatprep.subr.msk.mxu0 %vm710_vm8, %v1660_v19 }
 0x3a3   :  { %v1898_v22 = vpop.permute.xlu1 %1897 }
 0x3a4   :  { %v1899_v33 = vsel %vm701_vm7, %v1896_v20, %v1898_v22 }
 0x3a7   :  { %v2135_v24 = vpop.permute.xlu1 %2134 }
 0x3ab   :  { %v2137_v6 = vpop.permute.xlu1 %2136 }
 0x3ac   :  { %v2138_v35 = vsel %vm701_vm7, %v2135_v24, %v2137_v6  ;;  %v3117_v6 = vmov 0.0|0.0  }
 0x3ad   :  { %2919 = vmatprep.subr.bf16.mxu1 %v3117_v6 }
 0x3af   :  { %v2376_v8 = vpop.permute.xlu1 %2375 }
 0x3b0   :  { %v2377_v36 = vsel %vm701_vm7, %v2374_v21, %v2376_v8 }
 0x3bd   :  { %v1638_v23 = vpop.trf.xlu0 }
 0x3c1   :  { %v1639_v25 = vpop.trf.xlu0 }
 0x3c5   :  { %v1877_v26 = vpop.trf.xlu0 }
 0x3c9   :  { %v1878_v28 = vpop.trf.xlu0 }
 0x3cd   :  { %v2116_v31 = vpop.trf.xlu0 }
 0x3d1   :  { %v2117_v34 = vpop.trf.xlu0 }
 0x3d5   :  { %v2355_v37 = vpop.trf.xlu0 }
 0x3d9   :  { %v2356_v38 = vpop.trf.xlu0 }
 0x3e6   :  { %v1399_v29 = vpop.trf.xlu1 }
 0x3e7   :  { %2841 = vmatprep.mubr.msk.f32.mxu0 %vm703_vm6, %v1399_v29 }
 0x3ea   :  { %v1400_v32 = vpop.trf.xlu1 }
 0x3eb   :  { %2842 = vmatmul.mubr.msk.f32.vlgmr.msra.gmra.mrb[10].mxu0 %vm703_vm6, %v1400_v32  ;;  %v649_v45 = vpop.permute.xlu0 %648 }
 0x3ec   :  { %2852 = vmatpush3.msk.msra.mxu0 %vm710_vm8, %v1660_v19  ;;  %2853 = vmatprep.mubr.msk.f32.mxu0 %vm703_vm6, %v1638_v23  ;;  %v651_v47 = vmul.f32 %v649_v45, %v3272_v27  ;;  %v652_v52 = vmul.f32 %v649_v45, %v3275_v30  ;;  %v1268_v23 = vsub.s32 2, %v3205_v3 }
 0x3ed   :  { %2863 = vmatprep.subr.msk.mxu0 %vm710_vm8, %v1899_v33 }
 0x3ee   :  { %v653_v53 = vmul.f32 1.442695, %v651_v47  ;;  %v655_v55 = vmul.f32 1.442695, %v652_v52 }
 0x3ef   :  { %2854 = vmatmul.mubr.msk.f32.vlgmr.msra.gmra.mrb[12].mxu0 %vm703_vm6, %v1639_v25 }
 0x3f0   :  { %2864 = vmatpush3.msk.msra.mxu0 %vm710_vm8, %v1899_v33  ;;  %2865 = vmatprep.mubr.msk.f32.mxu0 %vm703_vm6, %v1877_v26  ;;  %3051 = vpow2.f32 %v653_v53 }
 0x3f1   :  { %2875 = vmatprep.subr.msk.mxu0 %vm710_vm8, %v2138_v35  ;;  %3053 = vpow2.f32 %v655_v55 }
 0x3f3   :  { %2866 = vmatmul.mubr.msk.f32.vlgmr.msra.gmra.mrb[14].mxu0 %vm703_vm6, %v1878_v28 }
 0x3f4   :  { %2876 = vmatpush3.msk.msra.mxu0 %vm710_vm8, %v2138_v35  ;;  %2877 = vmatprep.mubr.msk.f32.mxu0 %vm703_vm6, %v2116_v31  ;;  %v1507_v31 = vsub.s32 3, %v3205_v3 }
 0x3f5   :  { %2887 = vmatprep.subr.msk.mxu0 %vm710_vm8, %v2377_v36 }
 0x3f7   :  { %2878 = vmatmul.mubr.msk.f32.vlgmr.msra.gmra.mrb[16].mxu0 %vm703_vm6, %v2117_v34 }
 0x3f8   :  { %2888 = vmatpush3.msk.msra.mxu0 %vm710_vm8, %v2377_v36  ;;  %2889 = vmatprep.mubr.msk.f32.mxu0 %vm703_vm6, %v2355_v37 }
 0x3f9   :  { %2899 = vmatprep.subr.bf16.mxu0 %v3114_v61 }
 0x3fa   :  { %v3369_v63 = vpop.eup %3051 }
 0x3fb   :  { %2890 = vmatmul.mubr.msk.f32.vlgmr.msra.gmra.mrb[18].mxu0 %vm703_vm6, %v2356_v38  ;;  %v3372_v0 = vpop.eup %3053  ;;  %v791_v10 = vrot.slane %v3369_v63, %v3227_v14  ;;  %v1269_v29 = vrot.slane %v3369_v63, %v1268_v23 }
 0x3fc   :  { %v795_v11 = vrot.slane %v3372_v0, %v3227_v14  ;;  %v1034_v21 = vrot.slane %v3372_v0, %v3233_v16  ;;  %2915 = vmatprep.mubr.msk.bf16.mxu0 %vm3118_vm9, %v3114_v61  ;;  %v1273_v34 = vrot.slane %v3372_v0, %v1268_v23  ;;  %v1512_v45 = vrot.slane %v3372_v0, %v1507_v31 }
 0x3fd   :  { %v796_v13 = vmul.f32 0.0, %v791_v10 }
 0x3fe   :  { %v797_v15 = vmul.f32 0.0, %v795_v11 }
 0x45e   :  { %v2807_v39 = vpop.f32.mrb[4].mxu0 }
 0x45f   :  { %802 = vrot.lane.b32.xlu1 %v2807_v39, %s3112_s24  ;;  %v779_v40 = vpop.f32.mrb[5].mxu0 }
 0x463   :  { %800 = vrot.lane.b32.xlu1 %v779_v40, %s3112_s24  ;;  %v1508_v40 = vrot.slane %v3369_v63, %v1507_v31 }
 0x466   :  { %v2819_v41 = vpop.f32.mrb[6].mxu0 }
 0x467   :  { %1043 = vrot.lane.b32.xlu1 %v2819_v41, %s3112_s24  ;;  %v1018_v42 = vpop.f32.mrb[7].mxu0 }
 0x46b   :  { %1041 = vrot.lane.b32.xlu1 %v1018_v42, %s3112_s24 }
 0x46e   :  { %v2831_v43 = vpop.f32.mrb[8].mxu0 }
 0x46f   :  { %1282 = vrot.lane.b32.xlu1 %v2831_v43, %s3112_s24  ;;  %v1257_v44 = vpop.f32.mrb[9].mxu0 }
 0x470   :  { %1280 = vrot.lane.b32.xlu0 %v1257_v44, %s3112_s24 }
 0x4be   :  { %v2843_v54 = vpop.f32.mrb[10].mxu0 }
 0x4bf   :  { %1521 = vrot.lane.b32.xlu1 %v2843_v54, %s3112_s24  ;;  %v1496_v56 = vpop.f32.mrb[11].mxu0 }
 0x4c0   :  { %1519 = vrot.lane.b32.xlu0 %v1496_v56, %s3112_s24 }
 0x4c2   :  { %v2855_v57 = vpop.f32.mrb[12].mxu0 }
 0x4c3   :  { %1760 = vrot.lane.b32.xlu1 %v2855_v57, %s3112_s24  ;;  %v1735_v58 = vpop.f32.mrb[13].mxu0 }
 0x4c4   :  { %1758 = vrot.lane.b32.xlu0 %v1735_v58, %s3112_s24 }
 0x4c6   :  { %v2867_v59 = vpop.f32.mrb[14].mxu0 }
 0x4c7   :  { %1999 = vrot.lane.b32.xlu1 %v2867_v59, %s3112_s24  ;;  %v1974_v27 = vpop.f32.mrb[15].mxu0  ;;  %v1746_v59 = vsub.s32 4, %v3205_v3 }
 0x4c8   :  { %1997 = vrot.lane.b32.xlu0 %v1974_v27, %s3112_s24 }
 0x4c9   :  { %v1747_v10 = vrot.slane %v3369_v63, %v1746_v59  ;;  %v1751_v11 = vrot.slane %v3372_v0, %v1746_v59 }
 0x4ca   :  { %v2879_v30 = vpop.f32.mrb[16].mxu0 }
 0x4cb   :  { %2238 = vrot.lane.b32.xlu1 %v2879_v30, %s3112_s24  ;;  %v2213_v60 = vpop.f32.mrb[17].mxu0  ;;  %v1985_v30 = vsub.s32 5, %v3205_v3 }
 0x4cc   :  { %2236 = vrot.lane.b32.xlu0 %v2213_v60, %s3112_s24 }
 0x4ce   :  { %v2891_v7 = vpop.f32.mrb[18].mxu0 }
 0x4cf   :  { %2477 = vrot.lane.b32.xlu1 %v2891_v7, %s3112_s24  ;;  %v2452_v9 = vpop.f32.mrb[19].mxu0 }
 0x4d0   :  { %2475 = vrot.lane.b32.xlu0 %v2452_v9, %s3112_s24 }
 0x4d1   :  { %v803_v12 = vpop.permute.xlu1 %802 }
 0x4d2   :  { %v808_v18 = vadd.f32 %v803_v12, %v796_v13  ;;  %v809_v19 = vadd.f32 %v803_v12, %v797_v15 }
 0x4d3   :  { %1051 = vrot.lane.b32.xlu1 %v903_v5, %s3116_s5  ;;  %v1030_v5 = vrot.slane %v3369_v63, %v3233_v16 }
 0x4d4   :  { %811 = vrot.lane.b32.xlu0 %v3259_v2, %s3116_s5  ;;  %v1038_v25 = vmul.f32 %v1034_v21, %v809_v19  ;;  %v2953_v8 = vpack.i.bf16 %v809_v19, %v808_v18 }
 0x4d5   :  { %v801_v17 = vpop.permute.xlu1 %800  ;;  %v1037_v24 = vmul.f32 %v1030_v5, %v808_v18 }
 0x4d6   :  { %v806_v20 = vadd.f32 %v801_v17, %v796_v13  ;;  %v807_v14 = vadd.f32 %v801_v17, %v797_v15 }
 0x4d7   :  { %1529 = vrot.lane.b32.xlu1 %v1381_v51, %s3116_s5 }
 0x4d8   :  { %1290 = vrot.lane.b32.xlu0 %v1142_v4, %s3116_s5  ;;  %v1035_v51 = vmul.f32 %v1030_v5, %v806_v20  ;;  %v1036_v16 = vmul.f32 %v1034_v21, %v807_v14  ;;  %v2224_v21 = vsub.s32 6, %v3205_v3 }
 0x4d9   :  { %v1044_v22 = vpop.permute.xlu1 %1043 }
 0x4da   :  { %v1049_v4 = vadd.f32 %v1044_v22, %v1037_v24  ;;  %v1050_v26 = vadd.f32 %v1044_v22, %v1038_v25  ;;  %v1986_v25 = vrot.slane %v3369_v63, %v1985_v30 }
 0x4db   :  { %2007 = vrot.lane.b32.xlu1 %v1859_v48, %s3116_s5  ;;  %v2958_v48 = vpack.i.bf16 %v807_v14, %v806_v20 }
 0x4dc   :  { %1768 = vrot.lane.b32.xlu0 %v1620_v46, %s3116_s5  ;;  %v1276_v46 = vmul.f32 %v1269_v29, %v1049_v4  ;;  %v1277_v35 = vmul.f32 %v1273_v34, %v1050_v26  ;;  %v2963_v38 = vpack.i.bf16 %v1050_v26, %v1049_v4 }
 0x4dd   :  { %v1042_v28 = vpop.permute.xlu1 %1041 }
 0x4de   :  { %v1047_v32 = vadd.f32 %v1042_v28, %v1035_v51  ;;  %v1048_v33 = vadd.f32 %v1042_v28, %v1036_v16  ;;  %v1990_v51 = vrot.slane %v3372_v0, %v1985_v30 }
 0x4df   :  { %2954 = vrot.lane.b32.xlu1 %v2953_v8, %s3115_s4 }
 0x4e0   :  { %2959 = vrot.lane.b32.xlu0 %v2958_v48, %s3115_s4  ;;  %v1274_v36 = vmul.f32 %v1269_v29, %v1047_v32  ;;  %v1275_v37 = vmul.f32 %v1273_v34, %v1048_v33  ;;  %v2968_v41 = vpack.i.bf16 %v1048_v33, %v1047_v32  ;;  %v2463_v33 = vsub.s32 7, %v3205_v3 }
 0x4e1   :  { %v1283_v39 = vpop.permute.xlu1 %1282 }
 0x4e2   :  { %v1288_v42 = vadd.f32 %v1283_v39, %v1276_v46  ;;  %v1289_v43 = vadd.f32 %v1283_v39, %v1277_v35  ;;  %v1281_v44 = vpop.permute.xlu0 %1280 }
 0x4e3   :  { %v1286_v47 = vadd.f32 %v1281_v44, %v1274_v36  ;;  %v1287_v52 = vadd.f32 %v1281_v44, %v1275_v37  ;;  %2964 = vrot.lane.b32.xlu1 %v2963_v38, %s3115_s4  ;;  %v2225_v36 = vrot.slane %v3369_v63, %v2224_v21  ;;  %v2229_v37 = vrot.slane %v3372_v0, %v2224_v21 }
 0x4e4   :  { %2969 = vrot.lane.b32.xlu0 %v2968_v41, %s3115_s4  ;;  %v1515_v53 = vmul.f32 %v1508_v40, %v1288_v42  ;;  %v1516_v54 = vmul.f32 %v1512_v45, %v1289_v43  ;;  %v2973_v58 = vpack.i.bf16 %v1289_v43, %v1288_v42 }
 0x4e5   :  { %v2978_v55 = vpack.i.bf16 %v1287_v52, %v1286_v47  ;;  %v1513_v56 = vmul.f32 %v1508_v40, %v1286_v47  ;;  %v1514_v57 = vmul.f32 %v1512_v45, %v1287_v52 }
 0x4e7   :  { %2979 = vrot.lane.b32.xlu1 %v2978_v55, %s3115_s4  ;;  %v2468_v55 = vrot.slane %v3372_v0, %v2463_v33 }
 0x4e8   :  { %2974 = vrot.lane.b32.xlu0 %v2973_v58, %s3115_s4 }
 0x531   :  { %v1522_v27 = vpop.permute.xlu1 %1521 }
 0x532   :  { %v1527_v60 = vadd.f32 %v1522_v27, %v1515_v53  ;;  %v1528_v7 = vadd.f32 %v1522_v27, %v1516_v54  ;;  %v1520_v9 = vpop.permute.xlu0 %1519  ;;  %v2464_v54 = vrot.slane %v3369_v63, %v2463_v33 }
 0x533   :  { %v1525_v12 = vadd.f32 %v1520_v9, %v1513_v56  ;;  %v1526_v13 = vadd.f32 %v1520_v9, %v1514_v57 }
 0x534   :  { %v2983_v15 = vpack.i.bf16 %v1528_v7, %v1527_v60  ;;  %v1754_v17 = vmul.f32 %v1747_v10, %v1527_v60  ;;  %v1755_v18 = vmul.f32 %v1751_v11, %v1528_v7 }
 0x535   :  { %v2988_v19 = vpack.i.bf16 %v1526_v13, %v1525_v12  ;;  %v1761_v20 = vpop.permute.xlu1 %1760  ;;  %v1752_v14 = vmul.f32 %v1747_v10, %v1525_v12  ;;  %v1753_v5 = vmul.f32 %v1751_v11, %v1526_v13 }
 0x536   :  { %v1766_v22 = vadd.f32 %v1761_v20, %v1754_v17  ;;  %v1767_v23 = vadd.f32 %v1761_v20, %v1755_v18  ;;  %2984 = vrot.lane.b32.xlu1 %v2983_v15, %s3115_s4  ;;  %v1759_v24 = vpop.permute.xlu0 %1758 }
 0x537   :  { %v1764_v4 = vadd.f32 %v1759_v24, %v1752_v14  ;;  %v1765_v26 = vadd.f32 %v1759_v24, %v1753_v5  ;;  %2989 = vrot.lane.b32.xlu0 %v2988_v19, %s3115_s4 }
 0x538   :  { %v2993_v16 = vpack.i.bf16 %v1767_v23, %v1766_v22  ;;  %v1993_v8 = vmul.f32 %v1986_v25, %v1766_v22  ;;  %v1994_v28 = vmul.f32 %v1990_v51, %v1767_v23 }
 0x539   :  { %v2998_v29 = vpack.i.bf16 %v1765_v26, %v1764_v4  ;;  %v2000_v31 = vpop.permute.xlu1 %1999  ;;  %v1991_v48 = vmul.f32 %v1986_v25, %v1764_v4  ;;  %v1992_v32 = vmul.f32 %v1990_v51, %v1765_v26 }
 0x53a   :  { %v2005_v34 = vadd.f32 %v2000_v31, %v1993_v8  ;;  %v2006_v46 = vadd.f32 %v2000_v31, %v1994_v28  ;;  %v1998_v35 = vpop.permute.xlu0 %1997 }
 0x53b   :  { %v2003_v38 = vadd.f32 %v1998_v35, %v1991_v48  ;;  %v2004_v39 = vadd.f32 %v1998_v35, %v1992_v32  ;;  %2994 = vrot.lane.b32.xlu0 %v2993_v16, %s3115_s4  ;;  %2999 = vrot.lane.b32.xlu1 %v2998_v29, %s3115_s4 }
 0x53c   :  { %v3003_v40 = vpack.i.bf16 %v2006_v46, %v2005_v34  ;;  %v2232_v41 = vmul.f32 %v2225_v36, %v2005_v34  ;;  %v2233_v42 = vmul.f32 %v2229_v37, %v2006_v46 }
 0x53d   :  { %v3008_v43 = vpack.i.bf16 %v2004_v39, %v2003_v38  ;;  %v2239_v44 = vpop.permute.xlu1 %2238  ;;  %v2230_v45 = vmul.f32 %v2225_v36, %v2003_v38  ;;  %v2231_v3 = vmul.f32 %v2229_v37, %v2004_v39 }
 0x53e   :  { %v2244_v47 = vadd.f32 %v2239_v44, %v2232_v41  ;;  %v2245_v52 = vadd.f32 %v2239_v44, %v2233_v42  ;;  %v2237_v53 = vpop.permute.xlu0 %2236 }
 0x53f   :  { %v2242_v56 = vadd.f32 %v2237_v53, %v2230_v45  ;;  %v2243_v57 = vadd.f32 %v2237_v53, %v2231_v3  ;;  %3004 = vrot.lane.b32.xlu1 %v3003_v40, %s3115_s4  ;;  %3009 = vrot.lane.b32.xlu0 %v3008_v43, %s3115_s4 }
 0x540   :  { %v3013_v58 = vpack.i.bf16 %v2245_v52, %v2244_v47  ;;  %v2471_v59 = vmul.f32 %v2464_v54, %v2244_v47  ;;  %v2472_v27 = vmul.f32 %v2468_v55, %v2245_v52 }
 0x541   :  { %v3018_v30 = vpack.i.bf16 %v2243_v57, %v2242_v56  ;;  %v2478_v60 = vpop.permute.xlu1 %2477  ;;  %v2469_v7 = vmul.f32 %v2464_v54, %v2242_v56  ;;  %v2470_v9 = vmul.f32 %v2468_v55, %v2243_v57 }
 0x542   :  { %v2483_v10 = vadd.f32 %v2478_v60, %v2471_v59  ;;  %v2484_v11 = vadd.f32 %v2478_v60, %v2472_v27  ;;  %v2476_v12 = vpop.permute.xlu0 %2475 }
 0x543   :  { %v2481_v13 = vadd.f32 %v2476_v12, %v2469_v7  ;;  %v2482_v63 = vadd.f32 %v2476_v12, %v2470_v9  ;;  %3014 = vrot.lane.b32.xlu0 %v3013_v58, %s3115_s4  ;;  %3019 = vrot.lane.b32.xlu1 %v3018_v30, %s3115_s4 }
 0x544   :  { %v3023_v0 = vpack.i.bf16 %v2484_v11, %v2483_v10 }
 0x545   :  { %v3028_v15 = vpack.i.bf16 %v2482_v63, %v2481_v13  ;;  %v1052_v17 = vpop.permute.xlu1 %1051 }
 0x546   :  { %v812_v18 = vpop.permute.xlu0 %811 }
 0x547   :  { %3024 = vrot.lane.b32.xlu1 %v3023_v0, %s3115_s4  ;;  %3029 = vrot.lane.b32.xlu0 %v3028_v15, %s3115_s4 }
 0x549   :  { %v3440_v19 = vpop.permute.xlu1 %1529 }
 0x54a   :  { %v1291_v20 = vpop.permute.xlu0 %1290 }
 0x54b   :  { %2485 = vrot.lane.b32.xlu1 %v2337_v50, %s3116_s5  ;;  %2246 = vrot.lane.b32.xlu0 %v2098_v49, %s3116_s5 }
 0x54d   :  { %v3448_v14 = vpop.permute.xlu1 %2007 }
 0x54e   :  { %v3450_v5 = vpop.permute.xlu0 %1768 }
 0x551   :  { %v2955_v21 = vpop.permute.xlu1 %2954 }
 0x552   :  { %v2957_v22 = vunpack.i.h.bf16 %v2955_v21  ;;  %v2956_v23 = vunpack.i.l.bf16 %v2955_v21  ;;  %v2960_v24 = vpop.permute.xlu0 %2959 }
 0x553   :  { %v2962_v25 = vunpack.i.h.bf16 %v2960_v24  ;;  %v2961_v51 = vunpack.i.l.bf16 %v2960_v24 }
 0x554   :  { %v826_v4 = vsel %vm701_vm7, %v2956_v23, %v2957_v22 }
 0x555   :  { %v825_v26 = vsel %vm701_vm7, %v2961_v51, %v2962_v25  ;;  %v2965_v16 = vpop.permute.xlu1 %2964 }
 0x556   :  { %v2920_v50 = vpack.c.bf16 %v826_v4, %v825_v26  ;;  %v2967_v8 = vunpack.i.h.bf16 %v2965_v16  ;;  %v2966_v28 = vunpack.i.l.bf16 %v2965_v16  ;;  %v2970_v2 = vpop.permute.xlu0 %2969 }
 0x557   :  { %v2972_v49 = vunpack.i.h.bf16 %v2970_v2  ;;  %v2971_v29 = vunpack.i.l.bf16 %v2970_v2 }
 0x558   :  { %v1066_v31 = vsel %vm701_vm7, %v2966_v28, %v2967_v8  ;;  %2921 = vmatpush3.bf16.msra.mxu1 %v2920_v50 }
 0x559   :  { %v1065_v48 = vsel %vm701_vm7, %v2971_v29, %v2972_v49  ;;  %v2980_v32 = vpop.permute.xlu1 %2979  ;;  %2922 = vmatprep.subr.bf16.mxu1 %v3117_v6 }
 0x55a   :  { %v2923_v33 = vpack.c.bf16 %v1066_v31, %v1065_v48  ;;  %v2982_v34 = vunpack.i.h.bf16 %v2980_v32  ;;  %v2981_v46 = vunpack.i.l.bf16 %v2980_v32  ;;  %v2975_v35 = vpop.permute.xlu0 %2974  ;;  %v2611_v31 = vld [vmem:[%s3589_s9 + $0x8] sm:$0xff]  ;;  %v2613_v32 = vld [vmem:[%s3589_s9 + $0x18] sm:$0xff] }
 0x55b   :  { %v2977_v36 = vunpack.i.h.bf16 %v2975_v35  ;;  %v2976_v37 = vunpack.i.l.bf16 %v2975_v35  ;;  %2813 = vmatmul.mubr.msk.f32.vlgmr.msra.gmra.mrb[12].mxu1 %vm829_vm10, %v812_v18 }
 0x55c   :  { %v1304_v38 = vsel %vm701_vm7, %v2981_v46, %v2982_v34  ;;  %2924 = vmatpush3.bf16.msra.mxu1 %v2923_v33  ;;  %2824 = vmatprep.mubr.msk.f32.mxu1 %vm3118_vm9, %v3114_v61  ;;  %v2614_v34 = vld [vmem:[%s3589_s9 + $0x20] sm:$0xff]  ;;  %v2615_v46 = vld [vmem:[%s3589_s9 + $0x28] sm:$0xff] }
 0x55d   :  { %v1305_v39 = vsel %vm701_vm7, %v2976_v37, %v2977_v36  ;;  %2925 = vmatprep.subr.bf16.mxu1 %v3117_v6  ;;  %v2629_v35 = vpack.c.bf16 %v2615_v46, %v2614_v34 }
 0x55e   :  { %v2926_v40 = vpack.c.bf16 %v1305_v39, %v1304_v38 }
 0x55f   :  { %2825 = vmatmul.mubr.msk.f32.vlgmr.msra.gmra.mrb[14].mxu1 %vm829_vm10, %v1052_v17 }
 0x560   :  { %2927 = vmatpush3.bf16.msra.mxu1 %v2926_v40  ;;  %2836 = vmatprep.mubr.msk.f32.mxu1 %vm3118_vm9, %v3114_v61 }
 0x561   :  { %2928 = vmatprep.subr.bf16.mxu1 %v3117_v6 }
 0x563   :  { %2837 = vmatmul.mubr.msk.f32.vlgmr.msra.gmra.mrb[16].mxu1 %vm829_vm10, %v1291_v20 }
 0x564   :  { %2848 = vmatprep.mubr.msk.f32.mxu1 %vm3118_vm9, %v3114_v61 }
 0x5a8   :  { %v2985_v41 = vpop.permute.xlu1 %2984 }
 0x5a9   :  { %v2987_v42 = vunpack.i.h.bf16 %v2985_v41  ;;  %v2986_v43 = vunpack.i.l.bf16 %v2985_v41  ;;  %v2990_v44 = vpop.permute.xlu0 %2989 }
 0x5aa   :  { %v2992_v45 = vunpack.i.h.bf16 %v2990_v44  ;;  %v2991_v3 = vunpack.i.l.bf16 %v2990_v44 }
 0x5ab   :  { %v1544_v47 = vsel %vm701_vm7, %v2986_v43, %v2987_v42  ;;  %v2744_v42 = vmul.f32 -1.442695, %v3203_v62 }
 0x5ac   :  { %v1543_v52 = vsel %vm701_vm7, %v2991_v3, %v2992_v45 }
 0x5ad   :  { %v2929_v53 = vpack.c.bf16 %v1544_v47, %v1543_v52  ;;  %v3000_v54 = vpop.permute.xlu1 %2999  ;;  %v2995_v55 = vpop.permute.xlu0 %2994  ;;  %3055 = vpow2.f32 %v2744_v42 }
 0x5ae   :  { %v3002_v56 = vunpack.i.h.bf16 %v3000_v54  ;;  %v3001_v57 = vunpack.i.l.bf16 %v3000_v54  ;;  %v2997_v58 = vunpack.i.h.bf16 %v2995_v55  ;;  %v2996_v59 = vunpack.i.l.bf16 %v2995_v55 }
 0x5af   :  { %2930 = vmatpush3.bf16.msra.mxu1 %v2929_v53 }
 0x5b0   :  { %v1782_v27 = vsel %vm701_vm7, %v3001_v57, %v3002_v56  ;;  %v1783_v30 = vsel %vm701_vm7, %v2996_v59, %v2997_v58  ;;  %2931 = vmatprep.subr.bf16.mxu1 %v3117_v6  ;;  %v2743_v59 = vld [vmem:[%s3587_s7] ss:$0 sm:$0xff] }
 0x5b1   :  { %v2932_v60 = vpack.c.bf16 %v1783_v30, %v1782_v27  ;;  %v3005_v7 = vpop.permute.xlu1 %3004  ;;  %v3010_v9 = vpop.permute.xlu0 %3009  ;;  %v2584_v30 = vmul.f32 %v2743_v59, %v3257_v1  ;;  %v2618_v1 = vld [vmem:[%s3589_s9 + $0x40] sm:$0xff] }
 0x5b2   :  { %v3007_v10 = vunpack.i.h.bf16 %v3005_v7  ;;  %v3006_v11 = vunpack.i.l.bf16 %v3005_v7  ;;  %v3012_v12 = vunpack.i.h.bf16 %v3010_v9  ;;  %v3011_v13 = vunpack.i.l.bf16 %v3010_v9  ;;  %2849 = vmatmul.mubr.msk.f32.vlgmr.msra.gmra.mrb[18].mxu1 %vm829_vm10, %v3440_v19 }
 0x5b3   :  { %2933 = vmatpush3.bf16.msra.mxu1 %v2932_v60  ;;  %2860 = vmatprep.mubr.msk.f32.mxu1 %vm3118_vm9, %v3114_v61 }
 0x5b4   :  { %v2022_v63 = vsel %vm701_vm7, %v3006_v11, %v3007_v10  ;;  %v2021_v0 = vsel %vm701_vm7, %v3011_v13, %v3012_v12  ;;  %2934 = vmatprep.subr.bf16.mxu1 %v3117_v6  ;;  %v2616_v12 = vld [vmem:[%s3589_s9 + $0x30] sm:$0xff]  ;;  %v2617_v13 = vld [vmem:[%s3589_s9 + $0x38] sm:$0xff] }
 0x5b5   :  { %v2935_v15 = vpack.c.bf16 %v2022_v63, %v2021_v0  ;;  %v3020_v17 = vpop.permute.xlu1 %3019  ;;  %v3015_v18 = vpop.permute.xlu0 %3014  ;;  %v2630_v63 = vpack.c.bf16 %v2617_v13, %v2616_v12 }
 0x5b6   :  { %v3022_v20 = vunpack.i.h.bf16 %v3020_v17  ;;  %v3021_v21 = vunpack.i.l.bf16 %v3020_v17  ;;  %v3017_v22 = vunpack.i.h.bf16 %v3015_v18  ;;  %v3016_v23 = vunpack.i.l.bf16 %v3015_v18  ;;  %2861 = vmatmul.mubr.msk.f32.vlgmr.msra.gmra.mrb[20].mxu1 %vm829_vm10, %v3450_v5  ;;  %v2621_v17 = vld [vmem:[%s3589_s9 + $0x58] sm:$0xff] }
 0x5b7   :  { %2936 = vmatpush3.bf16.msra.mxu1 %v2935_v15  ;;  %2872 = vmatprep.mubr.msk.f32.mxu1 %vm3118_vm9, %v3114_v61  ;;  %v3056_v3 = vpop.eup %3055  ;;  %v2620_v15 = vld [vmem:[%s3589_s9 + $0x50] sm:$0xff] }
 0x5b8   :  { %v2260_v19 = vsel %vm701_vm7, %v3021_v21, %v3022_v20  ;;  %v2261_v24 = vsel %vm701_vm7, %v3016_v23, %v3017_v22  ;;  %2937 = vmatprep.subr.bf16.mxu1 %v3117_v6  ;;  %v2589_v52 = vadd.f32 1.0, %v3056_v3  ;;  %v2632_v18 = vpack.c.bf16 %v2621_v17, %v2620_v15  ;;  %v2622_v20 = vld [vmem:[%s3589_s9 + $0x60] sm:$0xff]  ;;  %v2623_v21 = vld [vmem:[%s3589_s9 + $0x68] sm:$0xff]  ;;  %v2624_v23 = vld [vmem:[%s3589_s9 + $0x70] sm:$0xff] }
 0x5b9   :  { %v2938_v25 = vpack.c.bf16 %v2261_v24, %v2260_v19  ;;  %v3025_v51 = vpop.permute.xlu1 %3024  ;;  %v3030_v4 = vpop.permute.xlu0 %3029  ;;  %v2633_v22 = vpack.c.bf16 %v2623_v21, %v2622_v20  ;;  %v2625_v19 = vld [vmem:[%s3589_s9 + $0x78] sm:$0xff] }
 0x5ba   :  { %v3027_v26 = vunpack.i.h.bf16 %v3025_v51  ;;  %v3026_v16 = vunpack.i.l.bf16 %v3025_v51  ;;  %v3032_v50 = vunpack.i.h.bf16 %v3030_v4  ;;  %v3031_v8 = vunpack.i.l.bf16 %v3030_v4  ;;  %2873 = vmatmul.mubr.msk.f32.vlgmr.msra.gmra.mrb[22].mxu1 %vm829_vm10, %v3448_v14  ;;  %v2610_v14 = vld [vmem:[%s3589_s9] sm:$0xff] }
 0x5bb   :  { %2939 = vmatpush3.bf16.msra.mxu1 %v2938_v25  ;;  %2884 = vmatprep.mubr.msk.f32.mxu1 %vm3118_vm9, %v3114_v61  ;;  %v2627_v48 = vpack.c.bf16 %v2611_v31, %v2610_v14  ;;  %3057 = vrcp.f32 %v2589_v52  ;;  %v2634_v24 = vpack.c.bf16 %v2625_v19, %v2624_v23 }
 0x5bc   :  { %v2500_v5 = vsel %vm701_vm7, %v3026_v16, %v3027_v26  ;;  %v2499_v28 = vsel %vm701_vm7, %v3031_v8, %v3032_v50  ;;  %2940 = vmatprep.subr.bf16.mxu1 %v3117_v6  ;;  %v2612_v6 = vld [vmem:[%s3589_s9 + $0x10] sm:$0xff]  ;;  %v2745_v16 = vld [vmem:[%s3588_s8] ss:$0 sm:$0xff] }
 0x5bd   :  { %v2941_v2 = vpack.c.bf16 %v2500_v5, %v2499_v28  ;;  %v2247_v49 = vpop.permute.xlu0 %2246  ;;  %v2486_v29 = vpop.permute.xlu1 %2485  ;;  %2900 = vmatpush3.bf16.msra.mxu0 %v2627_v48  ;;  %v2628_v33 = vpack.c.bf16 %v2613_v32, %v2612_v6 }
 0x5be   :  { %2885 = vmatmul.mubr.msk.f32.vlgmr.msra.gmra.mrb[24].mxu1 %vm829_vm10, %v2247_v49  ;;  %2901 = vmatprep.subr.bf16.mxu0 %v3114_v61 }
 0x5bf   :  { %2942 = vmatpush3.bf16.msra.mxu1 %v2941_v2  ;;  %2896 = vmatprep.mubr.msk.f32.mxu1 %vm3118_vm9, %v3114_v61 }
 0x5c1   :  { %2902 = vmatpush3.bf16.msra.mxu0 %v2628_v33 }
 0x5c2   :  { %2897 = vmatmul.mubr.msk.f32.vlgmr.msra.gmra.mrb[26].mxu1 %vm829_vm10, %v2486_v29  ;;  %2903 = vmatprep.subr.bf16.mxu0 %v3114_v61  ;;  %v3061_v29 = vld [vmem:[%s3580_s0] sm:$0xff] }
 0x5c5   :  { %2904 = vmatpush3.bf16.msra.mxu0 %v2629_v35  ;;  %v3058_v27 = vpop.eup %3057 }
 0x5c6   :  { %2905 = vmatprep.subr.bf16.mxu0 %v3114_v61  ;;  %v2592_v7 = vmul.f32 %v3058_v27, %v3203_v62  ;;  %v2619_v62 = vld [vmem:[%s3589_s9 + $0x48] sm:$0xff]  ;;  %s3119_s9 = smov [#allocation6]  }
 0x5c7   :  { %v2631_v0 = vpack.c.bf16 %v2619_v62, %v2618_v1  ;;  %s2684_s29 = sshll.u32 %s3119_s9, 4  ;;  %s2685_s29 = int_to_ptr.vmem [resolvable:$true] %s2684_s29 }
 0x5c8   :  { %s3084_s8 = scalar_lea.vmem %s2685_s29, 128  ;;  %p3089_p9 = scmp.lt.s32.totalorder %s2685_s29, %s2685_s29 }
 0x5c9   :  { %2906 = vmatpush3.bf16.msra.mxu0 %v2630_v63  ;;  %p3085_p8 = scmp.ne.s32.totalorder %s2685_s29, %s3084_s8  ;;  %p3090_p10 = scmp.lt.s32.totalorder %s3084_s8, %s3084_s8 }
 0x5ca   :  { %2907 = vmatprep.subr.bf16.mxu0 %v3114_v61 }
 0x5cb   :  { %p3091_p11 = por %p3090_p10, %p3089_p9 }
 0x5cd   :  { %2908 = vmatpush3.bf16.msra.mxu0 %v2631_v0  ;;  %p3092_p12 = pnand %p3091_p11, %p3085_p8 }
 0x5ce   :  { %2909 = vmatprep.subr.bf16.mxu0 %v3114_v61 }
 0x5d1   :  { %2910 = vmatpush3.bf16.msra.mxu0 %v2632_v18 }
 0x5d2   :  { %2911 = vmatprep.subr.bf16.mxu0 %v3114_v61 }
 0x5d5   :  { %2912 = vmatpush3.bf16.msra.mxu0 %v2633_v22 }
 0x5d6   :  { %2913 = vmatprep.subr.bf16.mxu0 %v3114_v61 }
 0x5d9   :  { %2914 = vmatpush3.bf16.msra.mxu0 %v2634_v24 }
 0x62e   :  { %v898_v36 = vpop.f32.mrb[12].mxu1 }
 0x62f   :  { %902 = vst [vmem:[#allocation2] sm:$0x1] %v898_v36  ;;  %v2814_v37 = vpop.f32.mrb[13].mxu1 }
 0x632   :  { %v1137_v38 = vpop.f32.mrb[14].mxu1 }
 0x633   :  { %1141 = vst [vmem:[#allocation2 + $0x1] sm:$0x1] %v1137_v38  ;;  %v2826_v39 = vpop.f32.mrb[15].mxu1 }
 0x636   :  { %v1376_v40 = vpop.f32.mrb[16].mxu1 }
 0x637   :  { %1380 = vst [vmem:[#allocation2 + $0x2] sm:$0x1] %v1376_v40  ;;  %v2838_v41 = vpop.f32.mrb[17].mxu1 }
 0x685   :  { %v1615_v43 = vpop.f32.mrb[18].mxu1 }
 0x686   :  { %1619 = vst [vmem:[#allocation2 + $0x3] sm:$0x1] %v1615_v43  ;;  %v2850_v44 = vpop.f32.mrb[19].mxu1 }
 0x689   :  { %v1854_v45 = vpop.f32.mrb[20].mxu1 }
 0x68a   :  { %1858 = vst [vmem:[#allocation2 + $0x4] sm:$0x1] %v1854_v45  ;;  %v2862_v47 = vpop.f32.mrb[21].mxu1 }
 0x68d   :  { %v2093_v53 = vpop.f32.mrb[22].mxu1 }
 0x68e   :  { %2097 = vst [vmem:[#allocation2 + $0x5] sm:$0x1] %v2093_v53  ;;  %v2874_v54 = vpop.f32.mrb[23].mxu1 }
 0x691   :  { %v2332_v55 = vpop.f32.mrb[24].mxu1 }
 0x692   :  { %2336 = vst [vmem:[#allocation2 + $0x6] sm:$0x1] %v2332_v55  ;;  %v2886_v56 = vpop.f32.mrb[25].mxu1 }
 0x695   :  { %v2571_v57 = vpop.f32.mrb[26].mxu1 }
 0x696   :  { %2575 = vst [vmem:[#allocation2 + $0x7] sm:$0x1] %v2571_v57  ;;  %v2898_v58 = vpop.f32.mrb[27].mxu1 }
 0x69d   :  { %v2576_v60 = vld [vmem:[#allocation2] sm:$0xff] }
 0x69e   :  { %v2585_v9 = vadd.f32 %v2584_v30, %v2576_v60 }
 0x6a0   :  { %v2593_v10 = vmul.f32 %v2592_v7, %v2585_v9 }
 0x6a2   :  { %v2595_v11 = vmul.f32 %v2593_v10, %v2593_v10 }
 0x6a4   :  { %2596 = vadd.xlane.f32.xlu0 %v2595_v11 }
 0x731   :  { %v2597_v25 = vpop.xlane.xlu0 %2596 }
 0x732   :  { %v2599_v51 = vmul.f32 0.0078125, %v2597_v25 }
 0x734   :  { %v2600_v4 = vadd.f32 1e-06, %v2599_v51 }
 0x736   :  { %3059 = vrsqrt.f32 %v2600_v4 }
 0x740   :  { %v3060_v26 = vpop.eup %3059 }
 0x741   :  { %v2602_v50 = vmul.f32 %v3060_v26, %v2593_v10 }
 0x743   :  { %v2609_v8 = vmul.f32 %v2745_v16, %v2602_v50 }
 0x745   :  { %v2626_v5 = vpack.c.bf16 %v2609_v8, %v2609_v8 }
 0x747   :  { %2916 = vmatmul.mubr.bf16.vlgmr.msra.gmra.mrb[20].mxu0 %v2626_v5 }
 0x81a   :  { %v2669_v28 = vpop.f32.mrb[20].mxu0 }
 0x81b   :  { %v2675_v2 = vmul.f32 0.22, %v2669_v28  ;;  %v2917_v49 = vpop.f32.mrb[21].mxu0 }
 0x81c   :  { %v2672_v61 = vpop.f32.mrb[22].mxu0 }
 0x81d   :  { %v2676_v14 = vadd.f32 %v3061_v29, %v2675_v2  ;;  %v2918_v31 = vpop.f32.mrb[23].mxu0 }
 0x81f   :  { %2677 = vst.msk [vmem:[#allocation6] sm:$0xff] %vm54_vm0, %v2676_v14 }
 0x820   :  { %3095 = shalt.err (!%p3092_p12)
}
 0x821   :  { %s3096_s12 = scalar_lea.hbm %s3590_s10, 128 }
 0x822   :  { %p3097_p13 = scmp.ne.s32.totalorder %s3590_s10, %s3096_s12  ;;  %p3100_p0 = scmp.lt.u32.totalorder %s3096_s12, %s3590_s10 }
 0x824   :  { %p3102_p1 = pnand %p3100_p0, %p3097_p13 }
 0x826   :  { %3105 = shalt.err (!%p3102_p1)
}
 0x827   :  { %2687 = dma.vmem_to_hbm [thread:$0]  %s2685_s29, 128, %s3590_s10, [#allocation5]  }
 0x828   :  { %3108 = dma.done.wait [#allocation5], 128  }
 0x829   :  { %3109 = vsyncadd [#allocation5], 4294967168 }
 0x82a   :  { %2691 = vsyncpa [#allocation4], 1 }
 0x82b   :  { %2692 = vsyncpa [#allocation5], 1 }

</bundles_post_ra>
